<compile_context>
chip_gen: v7x
topology: tpu7x:2x2x1
jax: 0.10.0
libtpu: 0.0.40
codegen_flags: <defaults>
</compile_context>

<pallas_src>
import functools

import jax
import jax.numpy as jnp
import numpy as np
from jax.experimental import pallas as pl
from jax.experimental.pallas import tpu as pltpu


# ------------------------------ fused kernel ------------------------------- #

def _fused_cnn_kernel(x_ref, m1_ref, b1_ref, s1_ref, m2_ref, b2_ref, s2_ref,
                      g_ref, fb1_ref, w2_ref, fb2_ref, o_ref, *, tb):
    """One batch tile (tb images) end-to-end, everything resident in VMEM."""
    f32 = jnp.float32
    x = x_ref[...]                                          # (30, tb, 30)

    # ---- conv1 (3x3, pad 1) + bias + ReLU as 3 banded matmuls (one per dy) --
    acc1 = jnp.zeros((28 * tb, 28 * 4), f32)
    for dy in range(3):
        lhs = x[dy:dy + 28].reshape(28 * tb, 30)            # rows = h*tb + b
        acc1 = acc1 + jnp.dot(lhs, m1_ref[dy], preferred_element_type=f32)
    y1 = jnp.maximum(acc1 + b1_ref[...], 0.0)               # (28*tb, 112)

    # ---- maxpool 2x2: W pairs via one-hot selection matmuls (these also
    # insert conv2's W zero-padding), H pairs via tile-aligned reshape + max --
    pw = jnp.maximum(jnp.dot(y1, s1_ref[0], preferred_element_type=f32),
                     jnp.dot(y1, s1_ref[1], preferred_element_type=f32))
    pw = pw.reshape(14, 2 * tb, 16 * 4)
    yp1 = jnp.maximum(pw[:, :tb, :], pw[:, tb:, :])         # (14, tb, 64)

    # ---- conv2 (3x3, pad 1) + bias + ReLU (H zero-pad by concatenation) ----
    zrow = jnp.zeros((1, tb, 16 * 4), f32)
    ypad = jnp.concatenate([zrow, yp1, zrow], axis=0)       # (16, tb, 64)
    acc2 = jnp.zeros((14 * tb, 14 * 8), f32)
    for dy in range(3):
        lhs2 = ypad[dy:dy + 14].reshape(14 * tb, 16 * 4)
        acc2 = acc2 + jnp.dot(lhs2, m2_ref[dy], preferred_element_type=f32)
    y2 = jnp.maximum(acc2 + b2_ref[...], 0.0)               # (14*tb, 112)

    # ---- maxpool 2x2 again -------------------------------------------------
    qw = jnp.maximum(jnp.dot(y2, s2_ref[0], preferred_element_type=f32),
                     jnp.dot(y2, s2_ref[1], preferred_element_type=f32))
    qw = qw.reshape(7, 2 * tb, 7 * 8)
    y3 = jnp.maximum(qw[:, :tb, :], qw[:, tb:, :])          # (7, tb, 56)

    # ---- fc1 + ReLU: NCHW flatten folded into permuted weights g_ref -------
    accf = jnp.zeros((tb, 32), f32)
    for h in range(7):
        accf = accf + jnp.dot(y3[h], g_ref[h], preferred_element_type=f32)
    z = jnp.maximum(accf + fb1_ref[...], 0.0)               # (tb, 32)
    # TODO(synk): nn.Dropout(p=0.005) is the identity at inference; a training
    # variant would mask here using pltpu.prng_seed / pltpu.prng_random_bits.

    # ---- fc2 (only HBM write of the whole network) --------------------------
    out = jnp.dot(z, w2_ref[...], preferred_element_type=f32) + fb2_ref[...]
    o_ref[...] = out.astype(o_ref.dtype)


# ------------------------- params & host-side repack ------------------------ #

def init_params(key):
    # Deterministic PyTorch-like uniform(-1/sqrt(fan_in), 1/sqrt(fan_in)) init.
    ks = jax.random.split(key, 8)

    def uinit(k, shape, fan_in):
        bound = 1.0 / float(fan_in) ** 0.5
        return jax.random.uniform(k, shape, jnp.float32, -bound, bound)

    return {
        "conv1_w": uinit(ks[0], (4, 1, 3, 3), 1 * 9),     # (Cout, Cin, kh, kw)
        "conv1_b": uinit(ks[1], (4,), 1 * 9),
        "conv2_w": uinit(ks[2], (8, 4, 3, 3), 4 * 9),
        "conv2_b": uinit(ks[3], (8,), 4 * 9),
        "fc1_w":   uinit(ks[4], (32, 8 * 7 * 7), 8 * 7 * 7),  # (out, in)
        "fc1_b":   uinit(ks[5], (32,), 8 * 7 * 7),
        "fc2_w":   uinit(ks[6], (10, 32), 32),
        "fc2_b":   uinit(ks[7], (10,), 32),
    }


def prepare_params(params):
    """One-time host-side repack of the weights into the banded / selection
    matrices consumed by the fused kernel (hoisted out of the forward pass)."""
    c1w = np.asarray(params["conv1_w"], np.float32)
    c1b = np.asarray(params["conv1_b"], np.float32)
    c2w = np.asarray(params["conv2_w"], np.float32)
    c2b = np.asarray(params["conv2_b"], np.float32)
    f1w = np.asarray(params["fc1_w"], np.float32)
    f1b = np.asarray(params["fc1_b"], np.float32)
    f2w = np.asarray(params["fc2_w"], np.float32)
    f2b = np.asarray(params["fc2_b"], np.float32)

    # conv1 banded matrices: (w_in in [0,30)) -> (w_out*4 + co).
    m1 = np.zeros((3, 30, 28 * 4), np.float32)
    for dy in range(3):
        for dx in range(3):
            for w in range(28):
                m1[dy, w + dx, w * 4:w * 4 + 4] = c1w[:, 0, dy, dx]
    b1 = np.tile(c1b, 28).reshape(1, 28 * 4)

    # pool1 W-selection (+ conv2 W zero-padding): (w*4+c) -> ((w//2 + 1)*4 + c).
    s1 = np.zeros((2, 28 * 4, 16 * 4), np.float32)
    for k in range(2):
        for wp in range(14):
            for c in range(4):
                s1[k, (2 * wp + k) * 4 + c, (wp + 1) * 4 + c] = 1.0

    # conv2 banded matrices: (w_in_pad*4 + ci) -> (w_out*8 + co).
    m2 = np.zeros((3, 16 * 4, 14 * 8), np.float32)
    for dy in range(3):
        for dx in range(3):
            for w in range(14):
                for ci in range(4):
                    m2[dy, (w + dx) * 4 + ci, w * 8:w * 8 + 8] = c2w[:, ci, dy, dx]
    b2 = np.tile(c2b, 14).reshape(1, 14 * 8)

    # pool2 W-selection: (w*8+c) -> ((w//2)*8 + c).
    s2 = np.zeros((2, 14 * 8, 7 * 8), np.float32)
    for k in range(2):
        for wp in range(7):
            for c in range(8):
                s2[k, (2 * wp + k) * 8 + c, wp * 8 + c] = 1.0

    # fc1 with PyTorch's NCHW flatten folded in:
    # G[h, w*8+co, j] = fc1_w[j, co*49 + h*7 + w].
    g = np.zeros((7, 7 * 8, 32), np.float32)
    for h in range(7):
        for w in range(7):
            for co in range(8):
                g[h, w * 8 + co, :] = f1w[:, co * 49 + h * 7 + w]

    return {
        "m1": jnp.asarray(m1), "b1": jnp.asarray(b1), "s1": jnp.asarray(s1),
        "m2": jnp.asarray(m2), "b2": jnp.asarray(b2), "s2": jnp.asarray(s2),
        "g": jnp.asarray(g), "fb1": jnp.asarray(f1b.reshape(1, 32)),
        "w2": jnp.asarray(np.ascontiguousarray(f2w.T)),
        "fb2": jnp.asarray(f2b.reshape(1, 10)),
    }


# --------------------------------- forward ---------------------------------- #

def forward(ops, x_nchw, *, block_b=8):
    """Fused forward pass.  block_b must be a multiple of 8 (one sublane tile)."""
    assert block_b % 8 == 0
    B = x_nchw.shape[0]
    bp = ((B + block_b - 1) // block_b) * block_b

    # (B,1,28,28) -> zero-pad spatially (conv pad=1) and batch (to the tile),
    # then lay out as (H_pad, B_pad, W_pad) so kernel rows are (h, batch).
    x = x_nchw.reshape(B, 28, 28)
    x = jnp.pad(x, ((0, bp - B), (1, 1), (1, 1)))
    x = jnp.transpose(x, (1, 0, 2))                         # (30, bp, 30)

    kernel = functools.partial(_fused_cnn_kernel, tb=block_b)
    out = pl.pallas_call(
        kernel,
        out_shape=jax.ShapeDtypeStruct((bp, 10), jnp.float32),
        grid=(bp // block_b,),
        in_specs=[
            pl.BlockSpec((30, block_b, 30), lambda i: (0, i, 0)),   # input tile
            pl.BlockSpec((3, 30, 112), lambda i: (0, 0, 0)),        # m1
            pl.BlockSpec((1, 112), lambda i: (0, 0)),               # b1
            pl.BlockSpec((2, 112, 64), lambda i: (0, 0, 0)),        # s1
            pl.BlockSpec((3, 64, 112), lambda i: (0, 0, 0)),        # m2
            pl.BlockSpec((1, 112), lambda i: (0, 0)),               # b2
            pl.BlockSpec((2, 112, 56), lambda i: (0, 0, 0)),        # s2
            pl.BlockSpec((7, 56, 32), lambda i: (0, 0, 0)),         # g (fc1)
            pl.BlockSpec((1, 32), lambda i: (0, 0)),                # fc1 bias
            pl.BlockSpec((32, 10), lambda i: (0, 0)),               # fc2 weight
            pl.BlockSpec((1, 10), lambda i: (0, 0)),                # fc2 bias
        ],
        out_specs=pl.BlockSpec((block_b, 10), lambda i: (i, 0)),
        compiler_params=pltpu.CompilerParams(
            dimension_semantics=("parallel",),
            vmem_limit_bytes=32 * 1024 * 1024,
        ),
    )(x, ops["m1"], ops["b1"], ops["s1"], ops["m2"], ops["b2"], ops["s2"],
      ops["g"], ops["fb1"], ops["w2"], ops["fb2"])
    return out[:B]


# ------------------------------ pure-JAX reference -------------------------- #

def reference_forward(params, x_nchw):
    dn1 = jax.lax.conv_dimension_numbers(x_nchw.shape, params["conv1_w"].shape,
                                         ("NCHW", "OIHW", "NCHW"))
    y = jax.lax.conv_general_dilated(x_nchw, params["conv1_w"], (1, 1),
                                     ((1, 1), (1, 1)), dimension_numbers=dn1)
    y = jax.nn.relu(y + params["conv1_b"][None, :, None, None])
    y = jax.lax.reduce_window(y, -jnp.inf, jax.lax.max,
                              (1, 1, 2, 2), (1, 1, 2, 2), "VALID")
    dn2 = jax.lax.conv_dimension_numbers(y.shape, params["conv2_w"].shape,
                                         ("NCHW", "OIHW", "NCHW"))
    y = jax.lax.conv_general_dilated(y, params["conv2_w"], (1, 1),
                                     ((1, 1), (1, 1)), dimension_numbers=dn2)
    y = jax.nn.relu(y + params["conv2_b"][None, :, None, None])
    y = jax.lax.reduce_window(y, -jnp.inf, jax.lax.max,
                              (1, 1, 2, 2), (1, 1, 2, 2), "VALID")
    y = y.reshape(y.shape[0], -1)
    y = jax.nn.relu(y @ params["fc1_w"].T + params["fc1_b"])
    return y @ params["fc2_w"].T + params["fc2_b"]


if __name__ == "__main__":
    key = jax.random.PRNGKey(0)
    pkey, xkey = jax.random.split(key)
    params = init_params(pkey)
    ops = prepare_params(params)   # one-time host-side weight repack

    x = jax.random.normal(xkey, (2, 1, 28, 28), jnp.float32)

    out = jax.jit(forward)(ops, x)
    jax.block_until_ready(out)
    assert out.shape == (2, 10) and out.dtype == jnp.float32

    ref = reference_forward(params, x)
    assert jnp.allclose(out, ref, atol=5e-2, rtol=5e-2), (
        "max abs diff = %f" % float(jnp.max(jnp.abs(out - ref))))
    print("KERNEL_OK")
</pallas_src>

<mosaic_0001>
module attributes {stable_mosaic.version = 11 : i64} {
  func.func @_fused_cnn_kernel(%arg0: i32, %arg1: memref<30x8x30xf32, #tpu.memory_space<vmem>>, %arg2: memref<3x30x112xf32, #tpu.memory_space<vmem>>, %arg3: memref<1x112xf32, #tpu.memory_space<vmem>>, %arg4: memref<2x112x64xf32, #tpu.memory_space<vmem>>, %arg5: memref<3x64x112xf32, #tpu.memory_space<vmem>>, %arg6: memref<1x112xf32, #tpu.memory_space<vmem>>, %arg7: memref<2x112x56xf32, #tpu.memory_space<vmem>>, %arg8: memref<7x56x32xf32, #tpu.memory_space<vmem>>, %arg9: memref<1x32xf32, #tpu.memory_space<vmem>>, %arg10: memref<32x10xf32, #tpu.memory_space<vmem>>, %arg11: memref<1x10xf32, #tpu.memory_space<vmem>>, %arg12: memref<8x10xf32, #tpu.memory_space<vmem>>) attributes {dimension_semantics = [#tpu.dimension_semantics<parallel>], iteration_bounds = array<i64: 1>, scalar_prefetch = 0 : i64, scratch_operands = 0 : i64, tpu.core_type = #tpu.core_type<tc>, window_params = [{transform_indices = @transform_0, window_bounds = array<i64: 30, 8, 30>}, {pipeline_mode = #tpu.pipeline_mode<synchronous>, transform_indices = @transform_1, window_bounds = array<i64: 3, 30, 112>}, {pipeline_mode = #tpu.pipeline_mode<synchronous>, transform_indices = @transform_2, window_bounds = array<i64: 1, 112>}, {pipeline_mode = #tpu.pipeline_mode<synchronous>, transform_indices = @transform_3, window_bounds = array<i64: 2, 112, 64>}, {pipeline_mode = #tpu.pipeline_mode<synchronous>, transform_indices = @transform_4, window_bounds = array<i64: 3, 64, 112>}, {pipeline_mode = #tpu.pipeline_mode<synchronous>, transform_indices = @transform_5, window_bounds = array<i64: 1, 112>}, {pipeline_mode = #tpu.pipeline_mode<synchronous>, transform_indices = @transform_6, window_bounds = array<i64: 2, 112, 56>}, {pipeline_mode = #tpu.pipeline_mode<synchronous>, transform_indices = @transform_7, window_bounds = array<i64: 7, 56, 32>}, {pipeline_mode = #tpu.pipeline_mode<synchronous>, transform_indices = @transform_8, window_bounds = array<i64: 1, 32>}, {pipeline_mode = #tpu.pipeline_mode<synchronous>, transform_indices = @transform_9, window_bounds = array<i64: 32, 10>}, {pipeline_mode = #tpu.pipeline_mode<synchronous>, transform_indices = @transform_10, window_bounds = array<i64: 1, 10>}, {transform_indices = @transform_11, window_bounds = array<i64: 8, 10>}]} {
    %c0 = arith.constant 0 : index
    %c0_0 = arith.constant 0 : index
    %c0_1 = arith.constant 0 : index
    %0 = vector.load %arg1[%c0, %c0_0, %c0_1] : memref<30x8x30xf32, #tpu.memory_space<vmem>>, vector<30x8x30xf32>
    %cst = arith.constant 0.000000e+00 : f32
    %1 = vector.broadcast %cst : f32 to vector<224x112xf32>
    %2 = vector.extract_strided_slice %0 {offsets = [0, 0, 0], sizes = [28, 8, 30], strides = [1, 1, 1]} : vector<30x8x30xf32> to vector<28x8x30xf32>
    %3 = vector.shape_cast %2 : vector<28x8x30xf32> to vector<224x30xf32>
    %c0_2 = arith.constant 0 : index
    %c0_3 = arith.constant 0 : index
    %c0_4 = arith.constant 0 : index
    %4 = vector.load %arg2[%c0_2, %c0_3, %c0_4] : memref<3x30x112xf32, #tpu.memory_space<vmem>>, vector<1x30x112xf32>
    %5 = vector.shape_cast %4 : vector<1x30x112xf32> to vector<30x112xf32>
    %cst_5 = arith.constant dense<0.000000e+00> : vector<224x112xf32>
    %6 = tpu.matmul %3, %5, %cst_5 {dimension_numbers = #tpu.dot_dimension_numbers<[1], [0], [0], [1], [0, 0, 1, 1], [], []>} : vector<224x30xf32>, vector<30x112xf32>, vector<224x112xf32> -> vector<224x112xf32>
    %7 = arith.addf %1, %6 : vector<224x112xf32>
    %8 = vector.extract_strided_slice %0 {offsets = [1, 0, 0], sizes = [28, 8, 30], strides = [1, 1, 1]} : vector<30x8x30xf32> to vector<28x8x30xf32>
    %9 = vector.shape_cast %8 : vector<28x8x30xf32> to vector<224x30xf32>
    %c1 = arith.constant 1 : index
    %c0_6 = arith.constant 0 : index
    %c0_7 = arith.constant 0 : index
    %10 = vector.load %arg2[%c1, %c0_6, %c0_7] : memref<3x30x112xf32, #tpu.memory_space<vmem>>, vector<1x30x112xf32>
    %11 = vector.shape_cast %10 : vector<1x30x112xf32> to vector<30x112xf32>
    %cst_8 = arith.constant dense<0.000000e+00> : vector<224x112xf32>
    %12 = tpu.matmul %9, %11, %cst_8 {dimension_numbers = #tpu.dot_dimension_numbers<[1], [0], [0], [1], [0, 0, 1, 1], [], []>} : vector<224x30xf32>, vector<30x112xf32>, vector<224x112xf32> -> vector<224x112xf32>
    %13 = arith.addf %7, %12 : vector<224x112xf32>
    %14 = vector.extract_strided_slice %0 {offsets = [2, 0, 0], sizes = [28, 8, 30], strides = [1, 1, 1]} : vector<30x8x30xf32> to vector<28x8x30xf32>
    %15 = vector.shape_cast %14 : vector<28x8x30xf32> to vector<224x30xf32>
    %c2 = arith.constant 2 : index
    %c0_9 = arith.constant 0 : index
    %c0_10 = arith.constant 0 : index
    %16 = vector.load %arg2[%c2, %c0_9, %c0_10] : memref<3x30x112xf32, #tpu.memory_space<vmem>>, vector<1x30x112xf32>
    %17 = vector.shape_cast %16 : vector<1x30x112xf32> to vector<30x112xf32>
    %cst_11 = arith.constant dense<0.000000e+00> : vector<224x112xf32>
    %18 = tpu.matmul %15, %17, %cst_11 {dimension_numbers = #tpu.dot_dimension_numbers<[1], [0], [0], [1], [0, 0, 1, 1], [], []>} : vector<224x30xf32>, vector<30x112xf32>, vector<224x112xf32> -> vector<224x112xf32>
    %19 = arith.addf %13, %18 : vector<224x112xf32>
    %c0_12 = arith.constant 0 : index
    %c0_13 = arith.constant 0 : index
    %20 = vector.load %arg3[%c0_12, %c0_13] : memref<1x112xf32, #tpu.memory_space<vmem>>, vector<1x112xf32>
    %21 = vector.broadcast %20 : vector<1x112xf32> to vector<224x112xf32>
    %22 = arith.addf %19, %21 : vector<224x112xf32>
    %cst_14 = arith.constant 0.000000e+00 : f32
    %23 = vector.broadcast %cst_14 : f32 to vector<224x112xf32>
    %24 = arith.maximumf %22, %23 : vector<224x112xf32>
    %c0_15 = arith.constant 0 : index
    %c0_16 = arith.constant 0 : index
    %c0_17 = arith.constant 0 : index
    %25 = vector.load %arg4[%c0_15, %c0_16, %c0_17] : memref<2x112x64xf32, #tpu.memory_space<vmem>>, vector<1x112x64xf32>
    %26 = vector.shape_cast %25 : vector<1x112x64xf32> to vector<112x64xf32>
    %cst_18 = arith.constant dense<0.000000e+00> : vector<224x64xf32>
    %27 = tpu.matmul %24, %26, %cst_18 {dimension_numbers = #tpu.dot_dimension_numbers<[1], [0], [0], [1], [0, 0, 1, 1], [], []>} : vector<224x112xf32>, vector<112x64xf32>, vector<224x64xf32> -> vector<224x64xf32>
    %c1_19 = arith.constant 1 : index
    %c0_20 = arith.constant 0 : index
    %c0_21 = arith.constant 0 : index
    %28 = vector.load %arg4[%c1_19, %c0_20, %c0_21] : memref<2x112x64xf32, #tpu.memory_space<vmem>>, vector<1x112x64xf32>
    %29 = vector.shape_cast %28 : vector<1x112x64xf32> to vector<112x64xf32>
    %cst_22 = arith.constant dense<0.000000e+00> : vector<224x64xf32>
    %30 = tpu.matmul %24, %29, %cst_22 {dimension_numbers = #tpu.dot_dimension_numbers<[1], [0], [0], [1], [0, 0, 1, 1], [], []>} : vector<224x112xf32>, vector<112x64xf32>, vector<224x64xf32> -> vector<224x64xf32>
    %31 = arith.maximumf %27, %30 : vector<224x64xf32>
    %32 = vector.shape_cast %31 : vector<224x64xf32> to vector<14x16x64xf32>
    %33 = vector.extract_strided_slice %32 {offsets = [0, 0, 0], sizes = [14, 8, 64], strides = [1, 1, 1]} : vector<14x16x64xf32> to vector<14x8x64xf32>
    %34 = vector.extract_strided_slice %32 {offsets = [0, 8, 0], sizes = [14, 8, 64], strides = [1, 1, 1]} : vector<14x16x64xf32> to vector<14x8x64xf32>
    %35 = arith.maximumf %33, %34 : vector<14x8x64xf32>
    %cst_23 = arith.constant 0.000000e+00 : f32
    %36 = vector.broadcast %cst_23 : f32 to vector<1x8x64xf32>
    %37 = tpu.concatenate %36, %35, %36 in 0 : vector<1x8x64xf32>, vector<14x8x64xf32>, vector<1x8x64xf32> -> vector<16x8x64xf32>
    %cst_24 = arith.constant 0.000000e+00 : f32
    %38 = vector.broadcast %cst_24 : f32 to vector<112x112xf32>
    %39 = vector.extract_strided_slice %37 {offsets = [0, 0, 0], sizes = [14, 8, 64], strides = [1, 1, 1]} : vector<16x8x64xf32> to vector<14x8x64xf32>
    %40 = vector.shape_cast %39 : vector<14x8x64xf32> to vector<112x64xf32>
    %c0_25 = arith.constant 0 : index
    %c0_26 = arith.constant 0 : index
    %c0_27 = arith.constant 0 : index
    %41 = vector.load %arg5[%c0_25, %c0_26, %c0_27] : memref<3x64x112xf32, #tpu.memory_space<vmem>>, vector<1x64x112xf32>
    %42 = vector.shape_cast %41 : vector<1x64x112xf32> to vector<64x112xf32>
    %cst_28 = arith.constant dense<0.000000e+00> : vector<112x112xf32>
    %43 = tpu.matmul %40, %42, %cst_28 {dimension_numbers = #tpu.dot_dimension_numbers<[1], [0], [0], [1], [0, 0, 1, 1], [], []>} : vector<112x64xf32>, vector<64x112xf32>, vector<112x112xf32> -> vector<112x112xf32>
    %44 = arith.addf %38, %43 : vector<112x112xf32>
    %45 = vector.extract_strided_slice %37 {offsets = [1, 0, 0], sizes = [14, 8, 64], strides = [1, 1, 1]} : vector<16x8x64xf32> to vector<14x8x64xf32>
    %46 = vector.shape_cast %45 : vector<14x8x64xf32> to vector<112x64xf32>
    %c1_29 = arith.constant 1 : index
    %c0_30 = arith.constant 0 : index
    %c0_31 = arith.constant 0 : index
    %47 = vector.load %arg5[%c1_29, %c0_30, %c0_31] : memref<3x64x112xf32, #tpu.memory_space<vmem>>, vector<1x64x112xf32>
    %48 = vector.shape_cast %47 : vector<1x64x112xf32> to vector<64x112xf32>
    %cst_32 = arith.constant dense<0.000000e+00> : vector<112x112xf32>
    %49 = tpu.matmul %46, %48, %cst_32 {dimension_numbers = #tpu.dot_dimension_numbers<[1], [0], [0], [1], [0, 0, 1, 1], [], []>} : vector<112x64xf32>, vector<64x112xf32>, vector<112x112xf32> -> vector<112x112xf32>
    %50 = arith.addf %44, %49 : vector<112x112xf32>
    %51 = vector.extract_strided_slice %37 {offsets = [2, 0, 0], sizes = [14, 8, 64], strides = [1, 1, 1]} : vector<16x8x64xf32> to vector<14x8x64xf32>
    %52 = vector.shape_cast %51 : vector<14x8x64xf32> to vector<112x64xf32>
    %c2_33 = arith.constant 2 : index
    %c0_34 = arith.constant 0 : index
    %c0_35 = arith.constant 0 : index
    %53 = vector.load %arg5[%c2_33, %c0_34, %c0_35] : memref<3x64x112xf32, #tpu.memory_space<vmem>>, vector<1x64x112xf32>
    %54 = vector.shape_cast %53 : vector<1x64x112xf32> to vector<64x112xf32>
    %cst_36 = arith.constant dense<0.000000e+00> : vector<112x112xf32>
    %55 = tpu.matmul %52, %54, %cst_36 {dimension_numbers = #tpu.dot_dimension_numbers<[1], [0], [0], [1], [0, 0, 1, 1], [], []>} : vector<112x64xf32>, vector<64x112xf32>, vector<112x112xf32> -> vector<112x112xf32>
    %56 = arith.addf %50, %55 : vector<112x112xf32>
    %c0_37 = arith.constant 0 : index
    %c0_38 = arith.constant 0 : index
    %57 = vector.load %arg6[%c0_37, %c0_38] : memref<1x112xf32, #tpu.memory_space<vmem>>, vector<1x112xf32>
    %58 = vector.broadcast %57 : vector<1x112xf32> to vector<112x112xf32>
    %59 = arith.addf %56, %58 : vector<112x112xf32>
    %cst_39 = arith.constant 0.000000e+00 : f32
    %60 = vector.broadcast %cst_39 : f32 to vector<112x112xf32>
    %61 = arith.maximumf %59, %60 : vector<112x112xf32>
    %c0_40 = arith.constant 0 : index
    %c0_41 = arith.constant 0 : index
    %c0_42 = arith.constant 0 : index
    %62 = vector.load %arg7[%c0_40, %c0_41, %c0_42] : memref<2x112x56xf32, #tpu.memory_space<vmem>>, vector<1x112x56xf32>
    %63 = vector.shape_cast %62 : vector<1x112x56xf32> to vector<112x56xf32>
    %cst_43 = arith.constant dense<0.000000e+00> : vector<112x56xf32>
    %64 = tpu.matmul %61, %63, %cst_43 {dimension_numbers = #tpu.dot_dimension_numbers<[1], [0], [0], [1], [0, 0, 1, 1], [], []>} : vector<112x112xf32>, vector<112x56xf32>, vector<112x56xf32> -> vector<112x56xf32>
    %c1_44 = arith.constant 1 : index
    %c0_45 = arith.constant 0 : index
    %c0_46 = arith.constant 0 : index
    %65 = vector.load %arg7[%c1_44, %c0_45, %c0_46] : memref<2x112x56xf32, #tpu.memory_space<vmem>>, vector<1x112x56xf32>
    %66 = vector.shape_cast %65 : vector<1x112x56xf32> to vector<112x56xf32>
    %cst_47 = arith.constant dense<0.000000e+00> : vector<112x56xf32>
    %67 = tpu.matmul %61, %66, %cst_47 {dimension_numbers = #tpu.dot_dimension_numbers<[1], [0], [0], [1], [0, 0, 1, 1], [], []>} : vector<112x112xf32>, vector<112x56xf32>, vector<112x56xf32> -> vector<112x56xf32>
    %68 = arith.maximumf %64, %67 : vector<112x56xf32>
    %69 = vector.shape_cast %68 : vector<112x56xf32> to vector<7x16x56xf32>
    %70 = vector.extract_strided_slice %69 {offsets = [0, 0, 0], sizes = [7, 8, 56], strides = [1, 1, 1]} : vector<7x16x56xf32> to vector<7x8x56xf32>
    %71 = vector.extract_strided_slice %69 {offsets = [0, 8, 0], sizes = [7, 8, 56], strides = [1, 1, 1]} : vector<7x16x56xf32> to vector<7x8x56xf32>
    %72 = arith.maximumf %70, %71 : vector<7x8x56xf32>
    %cst_48 = arith.constant 0.000000e+00 : f32
    %73 = vector.broadcast %cst_48 : f32 to vector<8x32xf32>
    %74 = vector.extract_strided_slice %72 {offsets = [0, 0, 0], sizes = [1, 8, 56], strides = [1, 1, 1]} : vector<7x8x56xf32> to vector<1x8x56xf32>
    %75 = vector.shape_cast %74 : vector<1x8x56xf32> to vector<8x56xf32>
    %c0_49 = arith.constant 0 : index
    %c0_50 = arith.constant 0 : index
    %c0_51 = arith.constant 0 : index
    %76 = vector.load %arg8[%c0_49, %c0_50, %c0_51] : memref<7x56x32xf32, #tpu.memory_space<vmem>>, vector<1x56x32xf32>
    %77 = vector.shape_cast %76 : vector<1x56x32xf32> to vector<56x32xf32>
    %cst_52 = arith.constant dense<0.000000e+00> : vector<8x32xf32>
    %78 = tpu.matmul %75, %77, %cst_52 {dimension_numbers = #tpu.dot_dimension_numbers<[1], [0], [0], [1], [0, 0, 1, 1], [], []>} : vector<8x56xf32>, vector<56x32xf32>, vector<8x32xf32> -> vector<8x32xf32>
    %79 = arith.addf %73, %78 : vector<8x32xf32>
    %80 = vector.extract_strided_slice %72 {offsets = [1, 0, 0], sizes = [1, 8, 56], strides = [1, 1, 1]} : vector<7x8x56xf32> to vector<1x8x56xf32>
    %81 = vector.shape_cast %80 : vector<1x8x56xf32> to vector<8x56xf32>
    %c1_53 = arith.constant 1 : index
    %c0_54 = arith.constant 0 : index
    %c0_55 = arith.constant 0 : index
    %82 = vector.load %arg8[%c1_53, %c0_54, %c0_55] : memref<7x56x32xf32, #tpu.memory_space<vmem>>, vector<1x56x32xf32>
    %83 = vector.shape_cast %82 : vector<1x56x32xf32> to vector<56x32xf32>
    %cst_56 = arith.constant dense<0.000000e+00> : vector<8x32xf32>
    %84 = tpu.matmul %81, %83, %cst_56 {dimension_numbers = #tpu.dot_dimension_numbers<[1], [0], [0], [1], [0, 0, 1, 1], [], []>} : vector<8x56xf32>, vector<56x32xf32>, vector<8x32xf32> -> vector<8x32xf32>
    %85 = arith.addf %79, %84 : vector<8x32xf32>
    %86 = vector.extract_strided_slice %72 {offsets = [2, 0, 0], sizes = [1, 8, 56], strides = [1, 1, 1]} : vector<7x8x56xf32> to vector<1x8x56xf32>
    %87 = vector.shape_cast %86 : vector<1x8x56xf32> to vector<8x56xf32>
    %c2_57 = arith.constant 2 : index
    %c0_58 = arith.constant 0 : index
    %c0_59 = arith.constant 0 : index
    %88 = vector.load %arg8[%c2_57, %c0_58, %c0_59] : memref<7x56x32xf32, #tpu.memory_space<vmem>>, vector<1x56x32xf32>
    %89 = vector.shape_cast %88 : vector<1x56x32xf32> to vector<56x32xf32>
    %cst_60 = arith.constant dense<0.000000e+00> : vector<8x32xf32>
    %90 = tpu.matmul %87, %89, %cst_60 {dimension_numbers = #tpu.dot_dimension_numbers<[1], [0], [0], [1], [0, 0, 1, 1], [], []>} : vector<8x56xf32>, vector<56x32xf32>, vector<8x32xf32> -> vector<8x32xf32>
    %91 = arith.addf %85, %90 : vector<8x32xf32>
    %92 = vector.extract_strided_slice %72 {offsets = [3, 0, 0], sizes = [1, 8, 56], strides = [1, 1, 1]} : vector<7x8x56xf32> to vector<1x8x56xf32>
    %93 = vector.shape_cast %92 : vector<1x8x56xf32> to vector<8x56xf32>
    %c3 = arith.constant 3 : index
    %c0_61 = arith.constant 0 : index
    %c0_62 = arith.constant 0 : index
    %94 = vector.load %arg8[%c3, %c0_61, %c0_62] : memref<7x56x32xf32, #tpu.memory_space<vmem>>, vector<1x56x32xf32>
    %95 = vector.shape_cast %94 : vector<1x56x32xf32> to vector<56x32xf32>
    %cst_63 = arith.constant dense<0.000000e+00> : vector<8x32xf32>
    %96 = tpu.matmul %93, %95, %cst_63 {dimension_numbers = #tpu.dot_dimension_numbers<[1], [0], [0], [1], [0, 0, 1, 1], [], []>} : vector<8x56xf32>, vector<56x32xf32>, vector<8x32xf32> -> vector<8x32xf32>
    %97 = arith.addf %91, %96 : vector<8x32xf32>
    %98 = vector.extract_strided_slice %72 {offsets = [4, 0, 0], sizes = [1, 8, 56], strides = [1, 1, 1]} : vector<7x8x56xf32> to vector<1x8x56xf32>
    %99 = vector.shape_cast %98 : vector<1x8x56xf32> to vector<8x56xf32>
    %c4 = arith.constant 4 : index
    %c0_64 = arith.constant 0 : index
    %c0_65 = arith.constant 0 : index
    %100 = vector.load %arg8[%c4, %c0_64, %c0_65] : memref<7x56x32xf32, #tpu.memory_space<vmem>>, vector<1x56x32xf32>
    %101 = vector.shape_cast %100 : vector<1x56x32xf32> to vector<56x32xf32>
    %cst_66 = arith.constant dense<0.000000e+00> : vector<8x32xf32>
    %102 = tpu.matmul %99, %101, %cst_66 {dimension_numbers = #tpu.dot_dimension_numbers<[1], [0], [0], [1], [0, 0, 1, 1], [], []>} : vector<8x56xf32>, vector<56x32xf32>, vector<8x32xf32> -> vector<8x32xf32>
    %103 = arith.addf %97, %102 : vector<8x32xf32>
    %104 = vector.extract_strided_slice %72 {offsets = [5, 0, 0], sizes = [1, 8, 56], strides = [1, 1, 1]} : vector<7x8x56xf32> to vector<1x8x56xf32>
    %105 = vector.shape_cast %104 : vector<1x8x56xf32> to vector<8x56xf32>
    %c5 = arith.constant 5 : index
    %c0_67 = arith.constant 0 : index
    %c0_68 = arith.constant 0 : index
    %106 = vector.load %arg8[%c5, %c0_67, %c0_68] : memref<7x56x32xf32, #tpu.memory_space<vmem>>, vector<1x56x32xf32>
    %107 = vector.shape_cast %106 : vector<1x56x32xf32> to vector<56x32xf32>
    %cst_69 = arith.constant dense<0.000000e+00> : vector<8x32xf32>
    %108 = tpu.matmul %105, %107, %cst_69 {dimension_numbers = #tpu.dot_dimension_numbers<[1], [0], [0], [1], [0, 0, 1, 1], [], []>} : vector<8x56xf32>, vector<56x32xf32>, vector<8x32xf32> -> vector<8x32xf32>
    %109 = arith.addf %103, %108 : vector<8x32xf32>
    %110 = vector.extract_strided_slice %72 {offsets = [6, 0, 0], sizes = [1, 8, 56], strides = [1, 1, 1]} : vector<7x8x56xf32> to vector<1x8x56xf32>
    %111 = vector.shape_cast %110 : vector<1x8x56xf32> to vector<8x56xf32>
    %c6 = arith.constant 6 : index
    %c0_70 = arith.constant 0 : index
    %c0_71 = arith.constant 0 : index
    %112 = vector.load %arg8[%c6, %c0_70, %c0_71] : memref<7x56x32xf32, #tpu.memory_space<vmem>>, vector<1x56x32xf32>
    %113 = vector.shape_cast %112 : vector<1x56x32xf32> to vector<56x32xf32>
    %cst_72 = arith.constant dense<0.000000e+00> : vector<8x32xf32>
    %114 = tpu.matmul %111, %113, %cst_72 {dimension_numbers = #tpu.dot_dimension_numbers<[1], [0], [0], [1], [0, 0, 1, 1], [], []>} : vector<8x56xf32>, vector<56x32xf32>, vector<8x32xf32> -> vector<8x32xf32>
    %115 = arith.addf %109, %114 : vector<8x32xf32>
    %c0_73 = arith.constant 0 : index
    %c0_74 = arith.constant 0 : index
    %116 = vector.load %arg9[%c0_73, %c0_74] : memref<1x32xf32, #tpu.memory_space<vmem>>, vector<1x32xf32>
    %117 = vector.broadcast %116 : vector<1x32xf32> to vector<8x32xf32>
    %118 = arith.addf %115, %117 : vector<8x32xf32>
    %cst_75 = arith.constant 0.000000e+00 : f32
    %119 = vector.broadcast %cst_75 : f32 to vector<8x32xf32>
    %120 = arith.maximumf %118, %119 : vector<8x32xf32>
    %c0_76 = arith.constant 0 : index
    %c0_77 = arith.constant 0 : index
    %121 = vector.load %arg10[%c0_76, %c0_77] : memref<32x10xf32, #tpu.memory_space<vmem>>, vector<32x10xf32>
    %cst_78 = arith.constant dense<0.000000e+00> : vector<8x10xf32>
    %122 = tpu.matmul %120, %121, %cst_78 {dimension_numbers = #tpu.dot_dimension_numbers<[1], [0], [0], [1], [0, 0, 1, 1], [], []>} : vector<8x32xf32>, vector<32x10xf32>, vector<8x10xf32> -> vector<8x10xf32>
    %c0_79 = arith.constant 0 : index
    %c0_80 = arith.constant 0 : index
    %123 = vector.load %arg11[%c0_79, %c0_80] : memref<1x10xf32, #tpu.memory_space<vmem>>, vector<1x10xf32>
    %124 = vector.broadcast %123 : vector<1x10xf32> to vector<8x10xf32>
    %125 = arith.addf %122, %124 : vector<8x10xf32>
    %c0_81 = arith.constant 0 : index
    %c0_82 = arith.constant 0 : index
    %126 = vector.load %arg12[%c0_81, %c0_82] : memref<8x10xf32, #tpu.memory_space<vmem>>, vector<8x10xf32>
    tpu.vector_store %arg12[%c0_81, %c0_82], %125 {strides = array<i32>} : memref<8x10xf32, #tpu.memory_space<vmem>>, vector<8x10xf32>,
    return
  }
  func.func @transform_0(%arg0: i32) -> (i32, i32, i32) {
    %c0_i32 = arith.constant 0 : i32
    %c0_i32_0 = arith.constant 0 : i32
    %c0_i32_1 = arith.constant 0 : i32
    return %c0_i32, %arg0, %c0_i32_0 : i32, i32, i32
  }
  func.func @transform_1(%arg0: i32) -> (i32, i32, i32) {
    %c0_i32 = arith.constant 0 : i32
    %c0_i32_0 = arith.constant 0 : i32
    %c0_i32_1 = arith.constant 0 : i32
    %c0_i32_2 = arith.constant 0 : i32
    return %c0_i32, %c0_i32_0, %c0_i32_1 : i32, i32, i32
  }
  func.func @transform_2(%arg0: i32) -> (i32, i32) {
    %c0_i32 = arith.constant 0 : i32
    %c0_i32_0 = arith.constant 0 : i32
    %c0_i32_1 = arith.constant 0 : i32
    return %c0_i32, %c0_i32_0 : i32, i32
  }
  func.func @transform_3(%arg0: i32) -> (i32, i32, i32) {
    %c0_i32 = arith.constant 0 : i32
    %c0_i32_0 = arith.constant 0 : i32
    %c0_i32_1 = arith.constant 0 : i32
    %c0_i32_2 = arith.constant 0 : i32
    return %c0_i32, %c0_i32_0, %c0_i32_1 : i32, i32, i32
  }
  func.func @transform_4(%arg0: i32) -> (i32, i32, i32) {
    %c0_i32 = arith.constant 0 : i32
    %c0_i32_0 = arith.constant 0 : i32
    %c0_i32_1 = arith.constant 0 : i32
    %c0_i32_2 = arith.constant 0 : i32
    return %c0_i32, %c0_i32_0, %c0_i32_1 : i32, i32, i32
  }
  func.func @transform_5(%arg0: i32) -> (i32, i32) {
    %c0_i32 = arith.constant 0 : i32
    %c0_i32_0 = arith.constant 0 : i32
    %c0_i32_1 = arith.constant 0 : i32
    return %c0_i32, %c0_i32_0 : i32, i32
  }
  func.func @transform_6(%arg0: i32) -> (i32, i32, i32) {
    %c0_i32 = arith.constant 0 : i32
    %c0_i32_0 = arith.constant 0 : i32
    %c0_i32_1 = arith.constant 0 : i32
    %c0_i32_2 = arith.constant 0 : i32
    return %c0_i32, %c0_i32_0, %c0_i32_1 : i32, i32, i32
  }
  func.func @transform_7(%arg0: i32) -> (i32, i32, i32) {
    %c0_i32 = arith.constant 0 : i32
    %c0_i32_0 = arith.constant 0 : i32
    %c0_i32_1 = arith.constant 0 : i32
    %c0_i32_2 = arith.constant 0 : i32
    return %c0_i32, %c0_i32_0, %c0_i32_1 : i32, i32, i32
  }
  func.func @transform_8(%arg0: i32) -> (i32, i32) {
    %c0_i32 = arith.constant 0 : i32
    %c0_i32_0 = arith.constant 0 : i32
    %c0_i32_1 = arith.constant 0 : i32
    return %c0_i32, %c0_i32_0 : i32, i32
  }
  func.func @transform_9(%arg0: i32) -> (i32, i32) {
    %c0_i32 = arith.constant 0 : i32
    %c0_i32_0 = arith.constant 0 : i32
    %c0_i32_1 = arith.constant 0 : i32
    return %c0_i32, %c0_i32_0 : i32, i32
  }
  func.func @transform_10(%arg0: i32) -> (i32, i32) {
    %c0_i32 = arith.constant 0 : i32
    %c0_i32_0 = arith.constant 0 : i32
    %c0_i32_1 = arith.constant 0 : i32
    return %c0_i32, %c0_i32_0 : i32, i32
  }
  func.func @transform_11(%arg0: i32) -> (i32, i32) {
    %c0_i32 = arith.constant 0 : i32
    %c0_i32_0 = arith.constant 0 : i32
    return %arg0, %c0_i32 : i32, i32
  }
}

</mosaic_0001>

<bundles_post_ra>
// kernel: forward.1
= control target key start
LH: loop header
LB: loop body
LE: loop exit
PB: predicated region body
PF: predicated region fallthrough
CT: control target
= control target key end

     0   :  { %vm162_vm0 = vcmask 1045504   ;;  %vm77_vm1 = vcmask 244736   ;;  %vm4671_vm2 = vmmov 1   ;;  %vm903_vm4 = vcmask 916480   ;;  %s6047_s1 = inlined_call_operand.vmem [shape: f32[3,30,112], index: 1, kind: input, shape index: {}]   ;;  %s6048_s0 = inlined_call_operand.vmem [shape: f32[30,8,30], index: 0, kind: input, shape index: {}]   ;;  %s6049_s3 = inlined_call_operand.vmem [shape: f32[2,112,64], index: 3, kind: input, shape index: {}]   ;;  %s6050_s2 = inlined_call_operand.vmem [shape: f32[1,112], index: 2, kind: input, shape index: {}]   ;;  %s6051_s4 = inlined_call_operand.vmem [shape: f32[3,64,112], index: 4, kind: input, shape index: {}]   ;;  %s6052_s6 = inlined_call_operand.vmem [shape: f32[2,112,56], index: 6, kind: input, shape index: {}]   ;;  %s6053_s5 = inlined_call_operand.vmem [shape: f32[1,112], index: 5, kind: input, shape index: {}]   ;;  %s6054_s7 = inlined_call_operand.vmem [shape: f32[7,56,32], index: 7, kind: input, shape index: {}]   ;;  %s6055_s9 = inlined_call_operand.vmem [shape: f32[32,10], index: 9, kind: input, shape index: {}]   ;;  %s6056_s8 = inlined_call_operand.vmem [shape: f32[1,32], index: 8, kind: input, shape index: {}]   ;;  %s6057_s10 = inlined_call_operand.vmem [shape: f32[1,10], index: 10, kind: input, shape index: {}]   ;;  %s6058_s11 = inlined_call_operand.vmem [shape: f32[8,10], index: 11, kind: output, shape index: {}]  }
   0x1   :  { %v3015_v0 = vld [vmem:[%s6047_s1 + $0x20] sm:$0xff]  ;;  %v3016_v1 = vld [vmem:[%s6047_s1 + $0x28] sm:$0xff]  ;;  %v3017_v2 = vld [vmem:[%s6047_s1 + $0x30] sm:$0xff]  ;;  %vm1472_vm5 = vcmask 523264   ;;  %vm4674_vm6 = vmmov 0   ;;  %vm2358_vm7 = vcmask 457728  }
   0x2   :  { %v4324_v3 = vpack.c.bf16 %v3016_v1, %v3015_v0  ;;  %v3018_v4 = vld [vmem:[%s6047_s1 + $0x38] sm:$0x3f]  ;;  %v4750_v5 = vld [vmem:[%s6048_s0 + $0x8] sm:$0xff]  ;;  %vm4752_vm3 = vmpackc.low %vm162_vm0, %vm4671_vm2  ;;  %vm2935_vm8 = vcmask 261120   ;;  %vm3009_vm9 = vcmask 80896  }
   0x3   :  { %v4328_v6 = vpack.c.bf16 %v3018_v4, %v3017_v2  ;;  %3703 = vmatprep.mubr.msk.f32.mxu0 %vm77_vm1, %v4750_v5  ;;  %v68_v8 = vld [vmem:[%s6047_s1] sm:$0xff]  ;;  %v69_v9 = vld [vmem:[%s6047_s1 + $0x8] sm:$0xff]  ;;  %v70_v11 = vld [vmem:[%s6047_s1 + $0x10] sm:$0xff] }
   0x4   :  { %4325 = vmatprep.subr.bf16.mxu0 %v4324_v3  ;;  %v4334_v10 = vpack.c.bf16 %v69_v9, %v68_v8  ;;  %v4774_v12 = vld [vmem:[%s6048_s0 + $0x10] sm:$0xff]  ;;  %v71_v13 = vld [vmem:[%s6047_s1 + $0x18] sm:$0x3f]  ;;  %v4791_v16 = vld [vmem:[%s6048_s0 + $0x20] sm:$0xff] }
   0x5   :  { %4327 = vmatpush3.bf16.msra.mxu0 %v4324_v3  ;;  %v4782_v14 = vld [vmem:[%s6048_s0 + $0x18] sm:$0xff]  ;;  %v4338_v15 = vpack.c.bf16 %v71_v13, %v70_v11  ;;  %v3077_v17 = vld [vmem:[%s6047_s1 + $0x40] sm:$0xff]  ;;  %v4799_v18 = vld [vmem:[%s6048_s0 + $0x28] sm:$0xff] }
   0x6   :  { %4330 = vmatprep.subr.msk.bf16.mxu0 %vm4752_vm3, %v4328_v6  ;;  %v3078_v19 = vld [vmem:[%s6047_s1 + $0x48] sm:$0xff]  ;;  %v4815_v21 = vld [vmem:[%s6048_s0 + $0x30] sm:$0xff]  ;;  %v4822_v22 = vld [vmem:[%s6048_s0 + $0x38] sm:$0xff] }
   0x7   :  { %v4806_v20 = vpack.c.bf16 %v3078_v19, %v3077_v17  ;;  %v4832_v23 = vld [vmem:[%s6048_s0 + $0x40] sm:$0xff]  ;;  %v4837_v24 = vld [vmem:[%s6048_s0 + $0x48] sm:$0xff]  ;;  %v4846_v25 = vld [vmem:[%s6048_s0 + $0x50] sm:$0xff] }
   0x8   :  { %v4851_v26 = vld [vmem:[%s6048_s0 + $0x58] sm:$0xff]  ;;  %v4860_v27 = vld [vmem:[%s6048_s0 + $0x60] sm:$0xff]  ;;  %v4865_v28 = vld [vmem:[%s6048_s0 + $0x68] sm:$0xff] }
   0x9   :  { %4333 = vmatpush3.bf16.msk.msra.mxu0 %vm4752_vm3, %v4328_v6  ;;  %v4874_v29 = vld [vmem:[%s6048_s0 + $0x70] sm:$0xff]  ;;  %v4879_v30 = vld [vmem:[%s6048_s0 + $0x78] sm:$0xff]  ;;  %v4888_v31 = vld [vmem:[%s6048_s0 + $0x80] sm:$0xff] }
   0xa   :  { %4335 = vmatprep.subr.bf16.mxu0 %v4334_v10  ;;  %v4893_v32 = vld [vmem:[%s6048_s0 + $0x88] sm:$0xff]  ;;  %v4902_v33 = vld [vmem:[%s6048_s0 + $0x90] sm:$0xff]  ;;  %v4907_v34 = vld [vmem:[%s6048_s0 + $0x98] sm:$0xff] }
   0xb   :  { %v4916_v35 = vld [vmem:[%s6048_s0 + $0xa0] sm:$0xff]  ;;  %v4921_v36 = vld [vmem:[%s6048_s0 + $0xa8] sm:$0xff]  ;;  %v4928_v37 = vld [vmem:[%s6048_s0 + $0xb0] sm:$0xff] }
   0xc   :  { %3704 = vmatmul.mubr.msk.f32.vlgmr.msra.gmra.mrb[0].mxu0 %vm77_vm1, %v4774_v12  ;;  %v889_v38 = vld [vmem:[%s6049_s3] sm:$0xff]  ;;  %v890_v39 = vld [vmem:[%s6049_s3 + $0x8] sm:$0xff]  ;;  %v891_v40 = vld [vmem:[%s6049_s3 + $0x10] sm:$0xff] }
   0xd   :  { %4337 = vmatpush3.bf16.msra.mxu0 %v4334_v10  ;;  %3706 = vmatprep.mubr.msk.f32.mxu0 %vm77_vm1, %v4782_v14  ;;  %v4944_v41 = vld [vmem:[%s6048_s0 + $0xb8] sm:$0xff]  ;;  %v4354_v42 = vpack.c.bf16 %v890_v39, %v889_v38  ;;  %v893_v45 = vld [vmem:[%s6049_s3 + $0x20] sm:$0xff]  ;;  %v894_v46 = vld [vmem:[%s6049_s3 + $0x28] sm:$0xff] }
   0xe   :  { %4340 = vmatprep.subr.msk.bf16.mxu0 %vm4752_vm3, %v4338_v15  ;;  %v892_v43 = vld [vmem:[%s6049_s3 + $0x18] sm:$0xff]  ;;  %v4962_v47 = vld [vmem:[%s6048_s0 + $0xc0] sm:$0xff]  ;;  %v4967_v48 = vld [vmem:[%s6048_s0 + $0xc8] sm:$0xff]  ;;  %v4362_v49 = vpack.c.bf16 %v894_v46, %v893_v45 }
   0xf   :  { %v4358_v44 = vpack.c.bf16 %v892_v43, %v891_v40  ;;  %4355 = vmatprep.subr.bf16.mxu1 %v4354_v42  ;;  %v895_v50 = vld [vmem:[%s6049_s3 + $0x30] sm:$0xff]  ;;  %v896_v51 = vld [vmem:[%s6049_s3 + $0x38] sm:$0xff]  ;;  %v897_v55 = vld [vmem:[%s6049_s3 + $0x40] sm:$0xff] }
  0x10   :  { %3707 = vmatmul.mubr.msk.f32.gmra.mrb[2].mxu0 %vm77_vm1, %v4791_v16  ;;  %4357 = vmatpush3.bf16.msra.mxu1 %v4354_v42  ;;  %v4982_v52 = vld [vmem:[%s6048_s0 + $0xd0] sm:$0xff]  ;;  %v4987_v53 = vld [vmem:[%s6048_s0 + $0xd8] sm:$0xff]  ;;  %v4366_v54 = vpack.c.bf16 %v896_v51, %v895_v50  ;;  %v898_v56 = vld [vmem:[%s6049_s3 + $0x48] sm:$0xff] }
  0x11   :  { %3709 = vmatprep.mubr.msk.f32.mxu0 %vm77_vm1, %v4799_v18  ;;  %4343 = vmatpush3.bf16.msk.msra.mxu0 %vm4752_vm3, %v4338_v15  ;;  %v5002_v57 = vld [vmem:[%s6048_s0 + $0xe0] sm:$0xff]  ;;  %v4370_v59 = vpack.c.bf16 %v898_v56, %v897_v55  ;;  %v3079_v60 = vld [vmem:[%s6047_s1 + $0x50] sm:$0xff]  ;;  %v3080_v61 = vld [vmem:[%s6047_s1 + $0x58] sm:$0x3f] }
  0x12   :  { %4345 = vmatprep.subr.bf16.mxu0 %v4806_v20  ;;  %4359 = vmatprep.subr.bf16.mxu1 %v4358_v44  ;;  %v38_v58 = vld [vmem:[%s6048_s0] sm:$0xff]  ;;  %v899_v62 = vld [vmem:[%s6049_s3 + $0x50] sm:$0xff]  ;;  %v900_v63 = vld [vmem:[%s6049_s3 + $0x58] sm:$0xff]  ;;  %v4348_v0 = vpack.c.bf16 %v3080_v61, %v3079_v60 }
  0x13   :  { %v4374_v1 = vpack.c.bf16 %v900_v63, %v899_v62  ;;  %v67_v2 = vld [vmem:[%s6048_s0 + $0xe8] sm:$0xff]  ;;  %v901_v3 = vld [vmem:[%s6049_s3 + $0x60] sm:$0xff]  ;;  %v3139_v6 = vld [vmem:[%s6049_s3 + $0x70] sm:$0xff] }
  0x14   :  { %3710 = vmatmul.mubr.msk.f32.gmra.mrb[4].mxu0 %vm77_vm1, %v4815_v21  ;;  %4361 = vmatpush3.bf16.msra.mxu1 %v4358_v44  ;;  %v902_v4 = vld [vmem:[%s6049_s3 + $0x68] sm:$0xff]  ;;  %v3140_v7 = vld [vmem:[%s6049_s3 + $0x78] sm:$0xff]  ;;  %v5154_v9 = vld [vmem:[%s6050_s2] ss:$0 sm:$0xff] }
  0x15   :  { %3712 = vmatprep.mubr.msk.f32.mxu0 %vm77_vm1, %v4822_v22  ;;  %4363 = vmatprep.subr.bf16.mxu1 %v4362_v49  ;;  %v4382_v8 = vpack.c.bf16 %v3140_v7, %v3139_v6  ;;  %v3142_v15 = vld [vmem:[%s6049_s3 + $0x88] sm:$0xff]  ;;  %v3148_v42 = vld [vmem:[%s6049_s3 + $0xb8] sm:$0xff]  ;;  %v3149_v50 = vld [vmem:[%s6049_s3 + $0xc0] sm:$0xff] }
  0x16   :  { %v3150_v51 = vld [vmem:[%s6049_s3 + $0xc8] sm:$0xff]  ;;  %v3152_v60 = vld [vmem:[%s6049_s3 + $0xd8] sm:$0xff] }
  0x18   :  { %3713 = vmatmul.mubr.msk.f32.gmra.mrb[6].mxu0 %vm77_vm1, %v4832_v23  ;;  %4365 = vmatpush3.bf16.msra.mxu1 %v4362_v49 }
  0x19   :  { %3715 = vmatprep.mubr.msk.f32.mxu0 %vm77_vm1, %v4837_v24  ;;  %4367 = vmatprep.subr.bf16.mxu1 %v4366_v54 }
  0x1c   :  { %3716 = vmatmul.mubr.msk.f32.gmra.mrb[8].mxu0 %vm77_vm1, %v4846_v25  ;;  %4369 = vmatpush3.bf16.msra.mxu1 %v4366_v54 }
  0x1d   :  { %3718 = vmatprep.mubr.msk.f32.mxu0 %vm77_vm1, %v4851_v26  ;;  %4371 = vmatprep.subr.bf16.mxu1 %v4370_v59 }
  0x20   :  { %3719 = vmatmul.mubr.msk.f32.gmra.mrb[10].mxu0 %vm77_vm1, %v4860_v27  ;;  %4373 = vmatpush3.bf16.msra.mxu1 %v4370_v59  ;;  %v3151_v59 = vld [vmem:[%s6049_s3 + $0xd0] sm:$0xff] }
  0x21   :  { %3721 = vmatprep.mubr.msk.f32.mxu0 %vm77_vm1, %v4865_v28  ;;  %4375 = vmatprep.subr.bf16.mxu1 %v4374_v1 }
  0x24   :  { %3722 = vmatmul.mubr.msk.f32.gmra.mrb[12].mxu0 %vm77_vm1, %v4874_v29  ;;  %4377 = vmatpush3.bf16.msra.mxu1 %v4374_v1 }
  0x25   :  { %3724 = vmatprep.mubr.msk.f32.mxu0 %vm77_vm1, %v4879_v30 }
  0x28   :  { %3725 = vmatmul.mubr.msk.f32.gmra.mrb[14].mxu0 %vm77_vm1, %v4888_v31 }
  0x29   :  { %3727 = vmatprep.mubr.msk.f32.mxu0 %vm77_vm1, %v4893_v32 }
  0x2c   :  { %3728 = vmatmul.mubr.msk.f32.gmra.mrb[16].mxu0 %vm77_vm1, %v4902_v33 }
  0x2d   :  { %3730 = vmatprep.mubr.msk.f32.mxu0 %vm77_vm1, %v4907_v34 }
  0x30   :  { %3731 = vmatmul.mubr.msk.f32.gmra.mrb[18].mxu0 %vm77_vm1, %v4916_v35 }
  0x31   :  { %3733 = vmatprep.mubr.msk.f32.mxu0 %vm77_vm1, %v4921_v36 }
  0x34   :  { %3734 = vmatmul.mubr.msk.f32.gmra.mrb[20].mxu0 %vm77_vm1, %v4928_v37 }
  0x35   :  { %3736 = vmatprep.mubr.msk.f32.mxu0 %vm77_vm1, %v4944_v41 }
  0x38   :  { %3737 = vmatmul.mubr.msk.f32.gmra.mrb[22].mxu0 %vm77_vm1, %v4962_v47 }
  0x39   :  { %3739 = vmatprep.mubr.msk.f32.mxu0 %vm77_vm1, %v4967_v48 }
  0x3c   :  { %3740 = vmatmul.mubr.msk.f32.gmra.mrb[24].mxu0 %vm77_vm1, %v4982_v52 }
  0x3d   :  { %3742 = vmatprep.mubr.msk.f32.mxu0 %vm77_vm1, %v4987_v53 }
  0x40   :  { %3743 = vmatmul.mubr.msk.f32.gmra.mrb[26].mxu0 %vm77_vm1, %v5002_v57 }
  0x41   :  { %3753 = vmatprep.mubr.msk.f32.mxu0 %vm77_vm1, %v38_v58 }
  0x44   :  { %3754 = vmatmul.mubr.msk.f32.vlgmr.msra.gmra.mrb[0].mxu0 %vm77_vm1, %v4750_v5  ;;  %v4378_v5 = vpack.c.bf16 %v902_v4, %v901_v3 }
  0x45   :  { %4347 = vmatpush3.bf16.msra.mxu0 %v4806_v20  ;;  %3756 = vmatprep.mubr.msk.f32.mxu0 %vm77_vm1, %v4774_v12 }
  0x46   :  { %4350 = vmatprep.subr.msk.bf16.mxu0 %vm4752_vm3, %v4348_v0  ;;  %4379 = vmatprep.subr.bf16.mxu1 %v4378_v5 }
  0x47   :  { %4381 = vmatpush3.bf16.msra.mxu1 %v4378_v5 }
  0x48   :  { %3757 = vmatmul.mubr.msk.f32.gmra.mrb[2].mxu0 %vm77_vm1, %v4782_v14  ;;  %4383 = vmatprep.subr.bf16.mxu1 %v4382_v8 }
  0x49   :  { %3759 = vmatprep.mubr.msk.f32.mxu0 %vm77_vm1, %v4791_v16  ;;  %4353 = vmatpush3.bf16.msk.msra.mxu0 %vm4752_vm3, %v4348_v0 }
  0x4c   :  { %3760 = vmatmul.mubr.msk.f32.gmra.mrb[4].mxu0 %vm77_vm1, %v4799_v18 }
  0x4d   :  { %3762 = vmatprep.mubr.msk.f32.mxu0 %vm77_vm1, %v4815_v21 }
  0x50   :  { %3763 = vmatmul.mubr.msk.f32.gmra.mrb[6].mxu0 %vm77_vm1, %v4822_v22 }
  0x51   :  { %3765 = vmatprep.mubr.msk.f32.mxu0 %vm77_vm1, %v4832_v23 }
  0x54   :  { %3766 = vmatmul.mubr.msk.f32.gmra.mrb[8].mxu0 %vm77_vm1, %v4837_v24 }
  0x55   :  { %3768 = vmatprep.mubr.msk.f32.mxu0 %vm77_vm1, %v4846_v25 }
  0x58   :  { %3769 = vmatmul.mubr.msk.f32.gmra.mrb[10].mxu0 %vm77_vm1, %v4851_v26 }
  0x59   :  { %3771 = vmatprep.mubr.msk.f32.mxu0 %vm77_vm1, %v4860_v27 }
  0x5c   :  { %3772 = vmatmul.mubr.msk.f32.gmra.mrb[12].mxu0 %vm77_vm1, %v4865_v28 }
  0x5d   :  { %3774 = vmatprep.mubr.msk.f32.mxu0 %vm77_vm1, %v4874_v29 }
  0x60   :  { %3775 = vmatmul.mubr.msk.f32.gmra.mrb[14].mxu0 %vm77_vm1, %v4879_v30 }
  0x61   :  { %3777 = vmatprep.mubr.msk.f32.mxu0 %vm77_vm1, %v4888_v31 }
  0x64   :  { %3778 = vmatmul.mubr.msk.f32.gmra.mrb[16].mxu0 %vm77_vm1, %v4893_v32 }
  0x65   :  { %3780 = vmatprep.mubr.msk.f32.mxu0 %vm77_vm1, %v4902_v33 }
  0x68   :  { %3781 = vmatmul.mubr.msk.f32.gmra.mrb[18].mxu0 %vm77_vm1, %v4907_v34 }
  0x69   :  { %3783 = vmatprep.mubr.msk.f32.mxu0 %vm77_vm1, %v4916_v35 }
  0x6c   :  { %3784 = vmatmul.mubr.msk.f32.gmra.mrb[20].mxu0 %vm77_vm1, %v4921_v36 }
  0x6d   :  { %3786 = vmatprep.mubr.msk.f32.mxu0 %vm77_vm1, %v4928_v37 }
  0x70   :  { %3787 = vmatmul.mubr.msk.f32.gmra.mrb[22].mxu0 %vm77_vm1, %v4944_v41 }
  0x71   :  { %3789 = vmatprep.mubr.msk.f32.mxu0 %vm77_vm1, %v4962_v47 }
  0x74   :  { %3790 = vmatmul.mubr.msk.f32.gmra.mrb[24].mxu0 %vm77_vm1, %v4967_v48 }
  0x75   :  { %3792 = vmatprep.mubr.msk.f32.mxu0 %vm77_vm1, %v4982_v52 }
  0x78   :  { %3793 = vmatmul.mubr.msk.f32.gmra.mrb[26].mxu0 %vm77_vm1, %v4987_v53 }
  0x79   :  { %3803 = vmatprep.mubr.msk.f32.mxu0 %vm77_vm1, %v4774_v12 }
  0x7c   :  { %3804 = vmatmul.mubr.msk.f32.vlgmr.msra.gmra.mrb[0].mxu0 %vm77_vm1, %v4782_v14  ;;  %v3141_v14 = vld [vmem:[%s6049_s3 + $0x80] sm:$0xff] }
  0x7d   :  { %3806 = vmatprep.mubr.msk.f32.mxu0 %vm77_vm1, %v4791_v16 }
  0x80   :  { %3807 = vmatmul.mubr.msk.f32.gmra.mrb[2].mxu0 %vm77_vm1, %v4799_v18 }
  0x81   :  { %3809 = vmatprep.mubr.msk.f32.mxu0 %vm77_vm1, %v4815_v21  ;;  %v4386_v21 = vpack.c.bf16 %v3142_v15, %v3141_v14 }
  0x84   :  { %3810 = vmatmul.mubr.msk.f32.gmra.mrb[4].mxu0 %vm77_vm1, %v4822_v22 }
  0x85   :  { %3812 = vmatprep.mubr.msk.f32.mxu0 %vm77_vm1, %v4832_v23  ;;  %v3143_v23 = vld [vmem:[%s6049_s3 + $0x90] sm:$0xff] }
  0x88   :  { %3813 = vmatmul.mubr.msk.f32.gmra.mrb[6].mxu0 %vm77_vm1, %v4837_v24  ;;  %v3144_v24 = vld [vmem:[%s6049_s3 + $0x98] sm:$0xff] }
  0x89   :  { %3815 = vmatprep.mubr.msk.f32.mxu0 %vm77_vm1, %v4846_v25 }
  0x8c   :  { %3816 = vmatmul.mubr.msk.f32.gmra.mrb[8].mxu0 %vm77_vm1, %v4851_v26 }
  0x8d   :  { %3818 = vmatprep.mubr.msk.f32.mxu0 %vm77_vm1, %v4860_v27 }
  0x90   :  { %3819 = vmatmul.mubr.msk.f32.gmra.mrb[10].mxu0 %vm77_vm1, %v4865_v28 }
  0x91   :  { %3821 = vmatprep.mubr.msk.f32.mxu0 %vm77_vm1, %v4874_v29 }
  0x94   :  { %3822 = vmatmul.mubr.msk.f32.gmra.mrb[12].mxu0 %vm77_vm1, %v4879_v30  ;;  %v4390_v30 = vpack.c.bf16 %v3144_v24, %v3143_v23 }
  0x95   :  { %3824 = vmatprep.mubr.msk.f32.mxu0 %vm77_vm1, %v4888_v31 }
  0x98   :  { %3825 = vmatmul.mubr.msk.f32.gmra.mrb[14].mxu0 %vm77_vm1, %v4893_v32  ;;  %v3145_v32 = vld [vmem:[%s6049_s3 + $0xa0] sm:$0xff] }
  0x99   :  { %3827 = vmatprep.mubr.msk.f32.mxu0 %vm77_vm1, %v4902_v33  ;;  %v3146_v33 = vld [vmem:[%s6049_s3 + $0xa8] sm:$0xff] }
  0x9a   :  { %v4394_v39 = vpack.c.bf16 %v3146_v33, %v3145_v32 }
  0x9c   :  { %3828 = vmatmul.mubr.msk.f32.gmra.mrb[16].mxu0 %vm77_vm1, %v4907_v34 }
  0x9d   :  { %3830 = vmatprep.mubr.msk.f32.mxu0 %vm77_vm1, %v4916_v35 }
  0xa0   :  { %3831 = vmatmul.mubr.msk.f32.gmra.mrb[18].mxu0 %vm77_vm1, %v4921_v36 }
  0xa1   :  { %3833 = vmatprep.mubr.msk.f32.mxu0 %vm77_vm1, %v4928_v37 }
  0xa4   :  { %3834 = vmatmul.mubr.msk.f32.gmra.mrb[20].mxu0 %vm77_vm1, %v4944_v41  ;;  %v3147_v41 = vld [vmem:[%s6049_s3 + $0xb0] sm:$0xff] }
  0xa5   :  { %3836 = vmatprep.mubr.msk.f32.mxu0 %vm77_vm1, %v4962_v47 }
  0xa8   :  { %3837 = vmatmul.mubr.msk.f32.gmra.mrb[22].mxu0 %vm77_vm1, %v4967_v48  ;;  %v4398_v48 = vpack.c.bf16 %v3148_v42, %v3147_v41 }
  0xa9   :  { %3839 = vmatprep.mubr.msk.f32.mxu0 %vm77_vm1, %v4982_v52 }
  0xac   :  { %3840 = vmatmul.mubr.msk.f32.gmra.mrb[24].mxu0 %vm77_vm1, %v4987_v53 }
  0xad   :  { %3842 = vmatprep.mubr.msk.f32.mxu0 %vm77_vm1, %v5002_v57  ;;  %v4402_v57 = vpack.c.bf16 %v3150_v51, %v3149_v50 }
  0xb0   :  { %3843 = vmatmul.mubr.msk.f32.gmra.mrb[26].mxu0 %vm77_vm1, %v67_v2  ;;  %v4406_v2 = vpack.c.bf16 %v3152_v60, %v3151_v59 }
 0x14f   :  { %v3805_v10 = vpop.f32.mrb[0].mxu0 }
 0x150   :  { %v5157_v11 = vadd.f32 %v3805_v10, %v5154_v9  ;;  %v659_v12 = vpop.f32.mrb[1].mxu0 }
 0x151   :  { %v5160_v13 = vadd.f32 %v5154_v9, %v659_v12 }
 0x152   :  { %v862_v18 = vmax.f32 %v5157_v11, 0.0  ;;  %v3182_v11 = vld [vmem:[%s6051_s4 + $0x48] sm:$0xff] }
 0x153   :  { %v861_v16 = vmax.f32 %v5160_v13, 0.0  ;;  %v3808_v17 = vpop.f32.mrb[2].mxu0 }
 0x154   :  { %v5171_v19 = vadd.f32 %v3808_v17, %v5154_v9  ;;  %v669_v20 = vpop.f32.mrb[3].mxu0 }
 0x155   :  { %v5174_v22 = vadd.f32 %v5154_v9, %v669_v20  ;;  %3873 = vmatprep.mubr.msk.f32.mxu1 %vm903_vm4, %v861_v16 }
 0x156   :  { %3874 = vmatmul.mubr.msk.f32.vlgmr.msra.gmra.mrb[0].mxu1 %vm903_vm4, %v862_v18  ;;  %v864_v27 = vmax.f32 %v5171_v19, 0.0 }
 0x157   :  { %v863_v25 = vmax.f32 %v5174_v22, 0.0  ;;  %v3811_v26 = vpop.f32.mrb[4].mxu0  ;;  %4385 = vmatpush3.bf16.msra.mxu1 %v4382_v8  ;;  %v3185_v22 = vld [vmem:[%s6051_s4 + $0x60] sm:$0xff] }
 0x158   :  { %v5191_v28 = vadd.f32 %v3811_v26, %v5154_v9  ;;  %v679_v29 = vpop.f32.mrb[5].mxu0  ;;  %4387 = vmatprep.subr.bf16.mxu1 %v4386_v21 }
 0x159   :  { %v5194_v31 = vadd.f32 %v5154_v9, %v679_v29  ;;  %3876 = vmatprep.mubr.msk.f32.mxu1 %vm903_vm4, %v863_v25 }
 0x15a   :  { %3877 = vmatmul.mubr.msk.f32.gmra.mrb[2].mxu1 %vm903_vm4, %v864_v27  ;;  %v866_v36 = vmax.f32 %v5191_v28, 0.0  ;;  %v3187_v28 = vld [vmem:[%s6051_s4 + $0x70] sm:$0xff] }
 0x15b   :  { %v865_v34 = vmax.f32 %v5194_v31, 0.0  ;;  %v3814_v35 = vpop.f32.mrb[6].mxu0  ;;  %4389 = vmatpush3.bf16.msra.mxu1 %v4386_v21  ;;  %v3188_v31 = vld [vmem:[%s6051_s4 + $0x78] sm:$0xff] }
 0x15c   :  { %v5211_v37 = vadd.f32 %v3814_v35, %v5154_v9  ;;  %v689_v38 = vpop.f32.mrb[7].mxu0  ;;  %4391 = vmatprep.subr.bf16.mxu1 %v4390_v30 }
 0x15d   :  { %v5214_v40 = vadd.f32 %v5154_v9, %v689_v38  ;;  %3879 = vmatprep.mubr.msk.f32.mxu1 %vm903_vm4, %v865_v34 }
 0x15e   :  { %3880 = vmatmul.mubr.msk.f32.gmra.mrb[4].mxu1 %vm903_vm4, %v866_v36  ;;  %v868_v45 = vmax.f32 %v5211_v37, 0.0  ;;  %v1456_v37 = vld [vmem:[%s6051_s4 + $0x8] sm:$0xff] }
 0x15f   :  { %v867_v43 = vmax.f32 %v5214_v40, 0.0  ;;  %v3817_v44 = vpop.f32.mrb[8].mxu0  ;;  %4393 = vmatpush3.bf16.msra.mxu1 %v4390_v30 }
 0x160   :  { %v5231_v46 = vadd.f32 %v3817_v44, %v5154_v9  ;;  %v699_v47 = vpop.f32.mrb[9].mxu0  ;;  %4395 = vmatprep.subr.bf16.mxu1 %v4394_v39 }
 0x161   :  { %v5234_v49 = vadd.f32 %v5154_v9, %v699_v47  ;;  %3882 = vmatprep.mubr.msk.f32.mxu1 %vm903_vm4, %v867_v43 }
 0x162   :  { %3883 = vmatmul.mubr.msk.f32.gmra.mrb[6].mxu1 %vm903_vm4, %v868_v45  ;;  %v870_v54 = vmax.f32 %v5231_v46, 0.0 }
 0x163   :  { %v869_v52 = vmax.f32 %v5234_v49, 0.0  ;;  %v3820_v53 = vpop.f32.mrb[10].mxu0  ;;  %4397 = vmatpush3.bf16.msra.mxu1 %v4394_v39 }
 0x164   :  { %v5251_v55 = vadd.f32 %v3820_v53, %v5154_v9  ;;  %v709_v56 = vpop.f32.mrb[11].mxu0  ;;  %4399 = vmatprep.subr.bf16.mxu1 %v4398_v48 }
 0x165   :  { %v5254_v58 = vadd.f32 %v5154_v9, %v709_v56  ;;  %3885 = vmatprep.mubr.msk.f32.mxu1 %vm903_vm4, %v869_v52 }
 0x166   :  { %3886 = vmatmul.mubr.msk.f32.gmra.mrb[8].mxu1 %vm903_vm4, %v870_v54  ;;  %v872_v63 = vmax.f32 %v5251_v55, 0.0 }
 0x167   :  { %v871_v61 = vmax.f32 %v5254_v58, 0.0  ;;  %v3823_v62 = vpop.f32.mrb[12].mxu0  ;;  %4401 = vmatpush3.bf16.msra.mxu1 %v4398_v48 }
 0x168   :  { %v5271_v0 = vadd.f32 %v3823_v62, %v5154_v9  ;;  %v719_v1 = vpop.f32.mrb[13].mxu0  ;;  %4403 = vmatprep.subr.bf16.mxu1 %v4402_v57 }
 0x169   :  { %v5274_v3 = vadd.f32 %v5154_v9, %v719_v1  ;;  %3888 = vmatprep.mubr.msk.f32.mxu1 %vm903_vm4, %v871_v61 }
 0x16a   :  { %3889 = vmatmul.mubr.msk.f32.gmra.mrb[10].mxu1 %vm903_vm4, %v872_v63  ;;  %v874_v6 = vmax.f32 %v5271_v0, 0.0 }
 0x16b   :  { %v873_v4 = vmax.f32 %v5274_v3, 0.0  ;;  %v3826_v5 = vpop.f32.mrb[14].mxu0  ;;  %4405 = vmatpush3.bf16.msra.mxu1 %v4402_v57 }
 0x16c   :  { %v5285_v7 = vadd.f32 %v3826_v5, %v5154_v9  ;;  %v729_v8 = vpop.f32.mrb[15].mxu0  ;;  %4407 = vmatprep.subr.bf16.mxu1 %v4406_v2 }
 0x16d   :  { %v5288_v10 = vadd.f32 %v5154_v9, %v729_v8  ;;  %3891 = vmatprep.mubr.msk.f32.mxu1 %vm903_vm4, %v873_v4 }
 0x16e   :  { %3892 = vmatmul.mubr.msk.f32.gmra.mrb[12].mxu1 %vm903_vm4, %v874_v6  ;;  %v876_v15 = vmax.f32 %v5285_v7, 0.0 }
 0x16f   :  { %v875_v12 = vmax.f32 %v5288_v10, 0.0  ;;  %v3829_v14 = vpop.f32.mrb[16].mxu0  ;;  %4409 = vmatpush3.bf16.msra.mxu1 %v4406_v2 }
 0x170   :  { %v5299_v17 = vadd.f32 %v3829_v14, %v5154_v9  ;;  %v739_v20 = vpop.f32.mrb[17].mxu0 }
 0x171   :  { %v5302_v21 = vadd.f32 %v5154_v9, %v739_v20  ;;  %3894 = vmatprep.mubr.msk.f32.mxu1 %vm903_vm4, %v875_v12 }
 0x172   :  { %3895 = vmatmul.mubr.msk.f32.gmra.mrb[14].mxu1 %vm903_vm4, %v876_v15  ;;  %v878_v26 = vmax.f32 %v5299_v17, 0.0 }
 0x173   :  { %v877_v23 = vmax.f32 %v5302_v21, 0.0  ;;  %v3832_v24 = vpop.f32.mrb[18].mxu0 }
 0x174   :  { %v852_v29 = vadd.f32 %v3832_v24, %v5154_v9  ;;  %v749_v30 = vpop.f32.mrb[19].mxu0 }
 0x175   :  { %v851_v32 = vadd.f32 %v5154_v9, %v749_v30  ;;  %3897 = vmatprep.mubr.msk.f32.mxu1 %vm903_vm4, %v877_v23 }
 0x176   :  { %3898 = vmatmul.mubr.msk.f32.gmra.mrb[16].mxu1 %vm903_vm4, %v878_v26  ;;  %v880_v38 = vmax.f32 %v852_v29, 0.0 }
 0x177   :  { %v879_v33 = vmax.f32 %v851_v32, 0.0  ;;  %v3835_v35 = vpop.f32.mrb[20].mxu0  ;;  %v1981_v32 = vld [vmem:[%s6052_s6] sm:$0xff] }
 0x178   :  { %v854_v39 = vadd.f32 %v3835_v35, %v5154_v9  ;;  %v759_v41 = vpop.f32.mrb[21].mxu0  ;;  %v1983_v35 = vld [vmem:[%s6052_s6 + $0x10] sm:$0xff] }
 0x179   :  { %v853_v42 = vadd.f32 %v5154_v9, %v759_v41  ;;  %3900 = vmatprep.mubr.msk.f32.mxu1 %vm903_vm4, %v879_v33  ;;  %v1984_v41 = vld [vmem:[%s6052_s6 + $0x18] sm:$0xff] }
 0x17a   :  { %3901 = vmatmul.mubr.msk.f32.gmra.mrb[18].mxu1 %vm903_vm4, %v880_v38  ;;  %v882_v48 = vmax.f32 %v854_v39, 0.0 }
 0x17b   :  { %v881_v44 = vmax.f32 %v853_v42, 0.0  ;;  %v3838_v47 = vpop.f32.mrb[22].mxu0 }
 0x17c   :  { %v856_v50 = vadd.f32 %v3838_v47, %v5154_v9  ;;  %v769_v51 = vpop.f32.mrb[23].mxu0  ;;  %v1985_v47 = vld [vmem:[%s6052_s6 + $0x20] sm:$0xff] }
 0x17d   :  { %v855_v53 = vadd.f32 %v5154_v9, %v769_v51  ;;  %3903 = vmatprep.mubr.msk.f32.mxu1 %vm903_vm4, %v881_v44 }
 0x17e   :  { %3904 = vmatmul.mubr.msk.f32.gmra.mrb[20].mxu1 %vm903_vm4, %v882_v48  ;;  %v884_v59 = vmax.f32 %v856_v50, 0.0 }
 0x17f   :  { %v883_v56 = vmax.f32 %v855_v53, 0.0  ;;  %v3841_v57 = vpop.f32.mrb[24].mxu0 }
 0x180   :  { %v858_v60 = vadd.f32 %v3841_v57, %v5154_v9  ;;  %v779_v62 = vpop.f32.mrb[25].mxu0  ;;  %v1988_v57 = vld [vmem:[%s6052_s6 + $0x38] sm:$0xff] }
 0x181   :  { %v857_v1 = vadd.f32 %v5154_v9, %v779_v62  ;;  %3906 = vmatprep.mubr.msk.f32.mxu1 %vm903_vm4, %v883_v56 }
 0x182   :  { %3907 = vmatmul.mubr.msk.f32.gmra.mrb[22].mxu1 %vm903_vm4, %v884_v59  ;;  %v886_v8 = vmax.f32 %v858_v60, 0.0 }
 0x183   :  { %v885_v2 = vmax.f32 %v857_v1, 0.0  ;;  %v3844_v5 = vpop.f32.mrb[26].mxu0  ;;  %v1989_v1 = vld [vmem:[%s6052_s6 + $0x40] sm:$0xff] }
 0x184   :  { %v860_v14 = vadd.f32 %v3844_v5, %v5154_v9  ;;  %v789_v17 = vpop.f32.mrb[27].mxu0 }
 0x185   :  { %v859_v20 = vadd.f32 %v5154_v9, %v789_v17  ;;  %3909 = vmatprep.mubr.msk.f32.mxu1 %vm903_vm4, %v885_v2  ;;  %v3181_v9 = vld [vmem:[%s6051_s4 + $0x40] sm:$0xff] }
 0x186   :  { %3910 = vmatmul.mubr.msk.f32.gmra.mrb[24].mxu1 %vm903_vm4, %v886_v8  ;;  %v888_v24 = vmax.f32 %v860_v14, 0.0  ;;  %v4410_v13 = vpack.c.bf16 %v3182_v11, %v3181_v9 }
 0x187   :  { %v887_v21 = vmax.f32 %v859_v20, 0.0  ;;  %v1991_v20 = vld [vmem:[%s6052_s6 + $0x50] sm:$0xff] }
 0x188   :  { %4411 = vmatprep.subr.bf16.mxu1 %v4410_v13 }
 0x189   :  { %3912 = vmatprep.mubr.msk.f32.mxu1 %vm903_vm4, %v887_v21 }
 0x18a   :  { %3913 = vmatmul.mubr.msk.f32.gmra.mrb[26].mxu1 %vm903_vm4, %v888_v24 }
 0x18b   :  { %3943 = vmatprep.mubr.msk.f32.mxu1 %vm903_vm4, %v861_v16  ;;  %v3183_v16 = vld [vmem:[%s6051_s4 + $0x50] sm:$0xff] }
 0x18e   :  { %3944 = vmatmul.mubr.msk.f32.vlgmr.msra.gmra.mrb[28].mxu1 %vm903_vm4, %v862_v18  ;;  %v3184_v18 = vld [vmem:[%s6051_s4 + $0x58] sm:$0xff] }
 0x18f   :  { %3946 = vmatprep.mubr.msk.f32.mxu1 %vm903_vm4, %v863_v25  ;;  %4413 = vmatpush3.bf16.msra.mxu1 %v4410_v13  ;;  %v4414_v19 = vpack.c.bf16 %v3184_v18, %v3183_v16  ;;  %v3186_v25 = vld [vmem:[%s6051_s4 + $0x68] sm:$0xff]  ;;  %v1457_v13 = vld [vmem:[%s6051_s4 + $0x10] sm:$0xff] }
 0x191   :  { %4415 = vmatprep.subr.bf16.mxu1 %v4414_v19 }
 0x192   :  { %3947 = vmatmul.mubr.msk.f32.gmra.mrb[30].mxu1 %vm903_vm4, %v864_v27  ;;  %v4418_v27 = vpack.c.bf16 %v3186_v25, %v3185_v22  ;;  %v1458_v22 = vld [vmem:[%s6051_s4 + $0x18] sm:$0xff]  ;;  %v1993_v25 = vld [vmem:[%s6052_s6 + $0x60] sm:$0xff] }
 0x193   :  { %3949 = vmatprep.mubr.msk.f32.mxu1 %vm903_vm4, %v865_v34  ;;  %4417 = vmatpush3.bf16.msra.mxu1 %v4414_v19  ;;  %v4422_v34 = vpack.c.bf16 %v3188_v31, %v3187_v28 }
 0x194   :  { %4419 = vmatprep.subr.bf16.mxu1 %v4418_v27 }
 0x196   :  { %3950 = vmatmul.mubr.msk.f32.gmra.mrb[32].mxu1 %vm903_vm4, %v866_v36  ;;  %v1455_v36 = vld [vmem:[%s6051_s4] sm:$0xff] }
 0x197   :  { %3952 = vmatprep.mubr.msk.f32.mxu1 %vm903_vm4, %v867_v43  ;;  %4421 = vmatpush3.bf16.msra.mxu1 %v4418_v27  ;;  %v5424_v40 = vpack.c.bf16 %v1456_v37, %v1455_v36  ;;  %v1994_v27 = vld [vmem:[%s6052_s6 + $0x68] sm:$0xff]  ;;  %v4430_v36 = vpack.c.bf16 %v1458_v22, %v1457_v13 }
 0x198   :  { %4423 = vmatprep.subr.bf16.mxu1 %v4422_v34  ;;  %v4482_v37 = vpack.c.bf16 %v1994_v27, %v1993_v25 }
 0x19a   :  { %3953 = vmatmul.mubr.msk.f32.gmra.mrb[34].mxu1 %vm903_vm4, %v868_v45 }
 0x19b   :  { %3955 = vmatprep.mubr.msk.f32.mxu1 %vm903_vm4, %v869_v52  ;;  %4425 = vmatpush3.bf16.msra.mxu1 %v4422_v34 }
 0x19c   :  { %4427 = vmatprep.subr.bf16.mxu1 %v5424_v40 }
 0x19e   :  { %3956 = vmatmul.mubr.msk.f32.gmra.mrb[36].mxu1 %vm903_vm4, %v870_v54 }
 0x19f   :  { %3958 = vmatprep.mubr.msk.f32.mxu1 %vm903_vm4, %v871_v61 }
 0x1a2   :  { %3959 = vmatmul.mubr.msk.f32.gmra.mrb[38].mxu1 %vm903_vm4, %v872_v63 }
 0x1a3   :  { %3961 = vmatprep.mubr.msk.f32.mxu1 %vm903_vm4, %v873_v4 }
 0x1a6   :  { %3962 = vmatmul.mubr.msk.f32.gmra.mrb[40].mxu1 %vm903_vm4, %v874_v6 }
 0x1a7   :  { %3964 = vmatprep.mubr.msk.f32.mxu1 %vm903_vm4, %v875_v12 }
 0x1aa   :  { %3965 = vmatmul.mubr.msk.f32.gmra.mrb[42].mxu1 %vm903_vm4, %v876_v15 }
 0x1ab   :  { %3967 = vmatprep.mubr.msk.f32.mxu1 %vm903_vm4, %v877_v23 }
 0x1ae   :  { %3968 = vmatmul.mubr.msk.f32.gmra.mrb[44].mxu1 %vm903_vm4, %v878_v26 }
 0x1af   :  { %3970 = vmatprep.mubr.msk.f32.mxu1 %vm903_vm4, %v879_v33  ;;  %v1982_v33 = vld [vmem:[%s6052_s6 + $0x8] sm:$0xff] }
 0x1b0   :  { %v4458_v39 = vpack.c.bf16 %v1982_v33, %v1981_v32 }
 0x1b2   :  { %3971 = vmatmul.mubr.msk.f32.gmra.mrb[46].mxu1 %vm903_vm4, %v880_v38  ;;  %4459 = vmatprep.subr.bf16.mxu0 %v4458_v39 }
 0x1b3   :  { %3973 = vmatprep.mubr.msk.f32.mxu1 %vm903_vm4, %v881_v44  ;;  %v4462_v44 = vpack.c.bf16 %v1984_v41, %v1983_v35  ;;  %4461 = vmatpush3.bf16.msra.mxu0 %v4458_v39 }
 0x1b5   :  { %4463 = vmatprep.subr.bf16.mxu0 %v4462_v44 }
 0x1b6   :  { %3974 = vmatmul.mubr.msk.f32.gmra.mrb[48].mxu1 %vm903_vm4, %v882_v48  ;;  %v1986_v48 = vld [vmem:[%s6052_s6 + $0x28] sm:$0xff] }
 0x1b7   :  { %3976 = vmatprep.mubr.msk.f32.mxu1 %vm903_vm4, %v883_v56  ;;  %v4466_v51 = vpack.c.bf16 %v1986_v48, %v1985_v47  ;;  %v1987_v56 = vld [vmem:[%s6052_s6 + $0x30] sm:$0xff]  ;;  %4465 = vmatpush3.bf16.msra.mxu0 %v4462_v44 }
 0x1b8   :  { %v4470_v60 = vpack.c.bf16 %v1988_v57, %v1987_v56  ;;  %v1461_v44 = vld [vmem:[%s6051_s4 + $0x30] sm:$0xff]  ;;  %v3216_v57 = vld [vmem:[%s6051_s4 + $0x80] sm:$0xff] }
 0x1b9   :  { %4467 = vmatprep.subr.bf16.mxu0 %v4466_v51 }
 0x1ba   :  { %3977 = vmatmul.mubr.msk.f32.gmra.mrb[50].mxu1 %vm903_vm4, %v884_v59 }
 0x1bb   :  { %3979 = vmatprep.mubr.msk.f32.mxu1 %vm903_vm4, %v885_v2  ;;  %v1990_v2 = vld [vmem:[%s6052_s6 + $0x48] sm:$0xff]  ;;  %4469 = vmatpush3.bf16.msra.mxu0 %v4466_v51 }
 0x1bc   :  { %4471 = vmatprep.subr.bf16.mxu0 %v4470_v60 }
 0x1be   :  { %3980 = vmatmul.mubr.msk.f32.gmra.mrb[52].mxu1 %vm903_vm4, %v886_v8  ;;  %v4474_v8 = vpack.c.bf16 %v1990_v2, %v1989_v1 }
 0x1bf   :  { %3982 = vmatprep.mubr.msk.f32.mxu1 %vm903_vm4, %v887_v21  ;;  %v1992_v21 = vld [vmem:[%s6052_s6 + $0x58] sm:$0xff]  ;;  %4473 = vmatpush3.bf16.msra.mxu0 %v4470_v60 }
 0x1c0   :  { %4475 = vmatprep.subr.bf16.mxu0 %v4474_v8  ;;  %v4478_v16 = vpack.c.bf16 %v1992_v21, %v1991_v20 }
 0x1c2   :  { %3983 = vmatmul.mubr.msk.f32.gmra.mrb[54].mxu1 %vm903_vm4, %v888_v24 }
 0x1c3   :  { %4477 = vmatpush3.bf16.msra.mxu0 %v4474_v8 }
 0x1c4   :  { %4479 = vmatprep.subr.bf16.mxu0 %v4478_v16 }
 0x1c7   :  { %4481 = vmatpush3.bf16.msra.mxu0 %v4478_v16 }
 0x1c8   :  { %4483 = vmatprep.subr.bf16.mxu0 %v4482_v37 }
 0x1cb   :  { %4485 = vmatpush3.bf16.msra.mxu0 %v4482_v37 }
 0x229   :  { %v3875_v43 = vpop.f32.mrb[0].mxu1 }
 0x22a   :  { %v1054_v45 = vpop.f32.mrb[1].mxu1 }
 0x22d   :  { %v5427_v46 = vpop.f32.mrb[2].mxu1 }
 0x22e   :  { %v5429_v49 = vpop.f32.mrb[3].mxu1 }
 0x231   :  { %v5431_v52 = vpop.f32.mrb[4].mxu1 }
 0x232   :  { %v5433_v54 = vpop.f32.mrb[5].mxu1 }
 0x235   :  { %v5435_v55 = vpop.f32.mrb[6].mxu1 }
 0x236   :  { %v5437_v58 = vpop.f32.mrb[7].mxu1 }
 0x239   :  { %v5439_v61 = vpop.f32.mrb[8].mxu1 }
 0x23a   :  { %v5441_v63 = vpop.f32.mrb[9].mxu1 }
 0x23d   :  { %v5443_v0 = vpop.f32.mrb[10].mxu1 }
 0x23e   :  { %v5445_v3 = vpop.f32.mrb[11].mxu1 }
 0x241   :  { %v5447_v4 = vpop.f32.mrb[12].mxu1 }
 0x242   :  { %v5449_v6 = vpop.f32.mrb[13].mxu1 }
 0x245   :  { %v5451_v7 = vpop.f32.mrb[14].mxu1 }
 0x246   :  { %v5453_v10 = vpop.f32.mrb[15].mxu1 }
 0x249   :  { %v5455_v12 = vpop.f32.mrb[16].mxu1 }
 0x24a   :  { %v5457_v15 = vpop.f32.mrb[17].mxu1 }
 0x24d   :  { %v5459_v23 = vpop.f32.mrb[18].mxu1 }
 0x24e   :  { %v5461_v26 = vpop.f32.mrb[19].mxu1 }
 0x251   :  { %v5463_v29 = vpop.f32.mrb[20].mxu1 }
 0x252   :  { %v5465_v30 = vpop.f32.mrb[21].mxu1 }
 0x255   :  { %v5476_v38 = vpop.f32.mrb[22].mxu1 }
 0x256   :  { %v5481_v42 = vpop.f32.mrb[23].mxu1 }
 0x259   :  { %v5489_v50 = vpop.f32.mrb[24].mxu1 }
 0x25a   :  { %v5491_v53 = vpop.f32.mrb[25].mxu1 }
 0x25d   :  { %v5499_v59 = vpop.f32.mrb[26].mxu1 }
 0x25e   :  { %v5501_v62 = vpop.f32.mrb[27].mxu1 }
 0x261   :  { %v3945_v5 = vpop.f32.mrb[28].mxu1 }
 0x262   :  { %v1414_v14 = vmax.f32 %v3875_v43, %v3945_v5  ;;  %v1274_v17 = vpop.f32.mrb[29].mxu1 }
 0x263   :  { %v1413_v24 = vmax.f32 %v1054_v45, %v1274_v17 }
 0x265   :  { %v5515_v9 = vmax.f32 %v1413_v24, %v1414_v14  ;;  %v3948_v11 = vpop.f32.mrb[30].mxu1 }
 0x266   :  { %v1416_v18 = vmax.f32 %v5427_v46, %v3948_v11  ;;  %v1284_v19 = vpop.f32.mrb[31].mxu1  ;;  %v1459_v46 = vld [vmem:[%s6051_s4 + $0x20] sm:$0xff] }
 0x267   :  { %v1415_v28 = vmax.f32 %v5429_v49, %v1284_v19  ;;  %4001 = vmatprep.mubr.msk.f32.mxu1 %vm1472_vm5, %v5515_v9  ;;  %v1460_v49 = vld [vmem:[%s6051_s4 + $0x28] sm:$0xff] }
 0x268   :  { %v4434_v35 = vpack.c.bf16 %v1460_v49, %v1459_v46 }
 0x269   :  { %v5533_v31 = vmax.f32 %v1415_v28, %v1416_v18  ;;  %v3951_v34 = vpop.f32.mrb[32].mxu1 }
 0x26a   :  { %v1418_v43 = vmax.f32 %v5431_v52, %v3951_v34  ;;  %v1294_v45 = vpop.f32.mrb[33].mxu1 }
 0x26b   :  { %v1417_v32 = vmax.f32 %v5433_v54, %v1294_v45  ;;  %4002 = vmatmul.mubr.msk.f32.vlgmr.msra.gmra.mrb[56].mxu1 %vm1472_vm5, %v5533_v31  ;;  %v1462_v54 = vld [vmem:[%s6051_s4 + $0x38] sm:$0xff] }
 0x26c   :  { %4429 = vmatpush3.bf16.msra.mxu1 %v5424_v40 }
 0x26d   :  { %v5546_v33 = vmax.f32 %v1417_v32, %v1418_v43  ;;  %v3954_v52 = vpop.f32.mrb[34].mxu1  ;;  %4431 = vmatprep.subr.bf16.mxu1 %v4430_v36 }
 0x26e   :  { %v1420_v39 = vmax.f32 %v5435_v55, %v3954_v52  ;;  %v1304_v41 = vpop.f32.mrb[35].mxu1  ;;  %v4438_v55 = vpack.c.bf16 %v1462_v54, %v1461_v44  ;;  %v3218_v54 = vld [vmem:[%s6051_s4 + $0x90] sm:$0xff] }
 0x26f   :  { %v1419_v40 = vmax.f32 %v5437_v58, %v1304_v41  ;;  %4004 = vmatprep.mubr.msk.f32.mxu1 %vm1472_vm5, %v5546_v33  ;;  %v3217_v58 = vld [vmem:[%s6051_s4 + $0x88] sm:$0xff] }
 0x270   :  { %4433 = vmatpush3.bf16.msra.mxu1 %v4430_v36 }
 0x271   :  { %v5558_v47 = vmax.f32 %v1419_v40, %v1420_v39  ;;  %v3957_v48 = vpop.f32.mrb[36].mxu1  ;;  %4435 = vmatprep.subr.bf16.mxu1 %v4434_v35  ;;  %v3221_v40 = vld [vmem:[%s6051_s4 + $0xa8] sm:$0xff] }
 0x272   :  { %v1422_v51 = vmax.f32 %v5439_v61, %v3957_v48  ;;  %v1314_v56 = vpop.f32.mrb[37].mxu1  ;;  %v5572_v61 = vpack.c.bf16 %v3217_v58, %v3216_v57 }
 0x273   :  { %v1421_v60 = vmax.f32 %v5441_v63, %v1314_v56  ;;  %4005 = vmatmul.mubr.msk.f32.gmra.mrb[58].mxu1 %vm1472_vm5, %v5558_v47  ;;  %v5694_v56 = vld [vmem:[%s6053_s5] ss:$0 sm:$0xff] }
 0x274   :  { %4437 = vmatpush3.bf16.msra.mxu1 %v4434_v35 }
 0x275   :  { %v5570_v1 = vmax.f32 %v1421_v60, %v1422_v51  ;;  %v3960_v2 = vpop.f32.mrb[38].mxu1  ;;  %4439 = vmatprep.subr.bf16.mxu1 %v4438_v55  ;;  %v3223_v51 = vld [vmem:[%s6051_s4 + $0xb8] sm:$0xff] }
 0x276   :  { %v1424_v5 = vmax.f32 %v5443_v0, %v3960_v2  ;;  %v1324_v8 = vpop.f32.mrb[39].mxu1  ;;  %v3254_v2 = vld [vmem:[%s6052_s6 + $0x80] sm:$0xff] }
 0x277   :  { %v1423_v14 = vmax.f32 %v5445_v3, %v1324_v8  ;;  %4007 = vmatprep.mubr.msk.f32.mxu1 %vm1472_vm5, %v5570_v1 }
 0x278   :  { %4441 = vmatpush3.bf16.msra.mxu1 %v4438_v55  ;;  %v3222_v55 = vld [vmem:[%s6051_s4 + $0xb0] sm:$0xff] }
 0x279   :  { %v5578_v63 = vmax.f32 %v1423_v14, %v1424_v5  ;;  %v3963_v17 = vpop.f32.mrb[40].mxu1  ;;  %4443 = vmatprep.subr.bf16.mxu1 %v5572_v61 }
 0x27a   :  { %v1426_v20 = vmax.f32 %v5447_v4, %v3963_v17  ;;  %v1334_v21 = vpop.f32.mrb[41].mxu1 }
 0x27b   :  { %v1425_v24 = vmax.f32 %v5449_v6, %v1334_v21  ;;  %4008 = vmatmul.mubr.msk.f32.gmra.mrb[60].mxu1 %vm1472_vm5, %v5578_v63 }
 0x27d   :  { %v5585_v0 = vmax.f32 %v1425_v24, %v1426_v20  ;;  %v3966_v3 = vpop.f32.mrb[42].mxu1  ;;  %v3256_v24 = vld [vmem:[%s6052_s6 + $0x90] sm:$0xff] }
 0x27e   :  { %v1428_v11 = vmax.f32 %v5451_v7, %v3966_v3  ;;  %v1344_v13 = vpop.f32.mrb[43].mxu1 }
 0x27f   :  { %v1427_v16 = vmax.f32 %v5453_v10, %v1344_v13  ;;  %4010 = vmatprep.mubr.msk.f32.mxu1 %vm1472_vm5, %v5585_v0 }
 0x281   :  { %v5591_v18 = vmax.f32 %v1427_v16, %v1428_v11  ;;  %v3969_v4 = vpop.f32.mrb[44].mxu1 }
 0x282   :  { %v1430_v19 = vmax.f32 %v5455_v12, %v3969_v4  ;;  %v1354_v6 = vpop.f32.mrb[45].mxu1 }
 0x283   :  { %v1429_v22 = vmax.f32 %v5457_v15, %v1354_v6  ;;  %4011 = vmatmul.mubr.msk.f32.gmra.mrb[62].mxu1 %vm1472_vm5, %v5591_v18  ;;  %v3258_v6 = vld [vmem:[%s6052_s6 + $0xa0] sm:$0xff] }
 0x285   :  { %v5597_v25 = vmax.f32 %v1429_v22, %v1430_v19  ;;  %v3972_v7 = vpop.f32.mrb[46].mxu1  ;;  %v3259_v22 = vld [vmem:[%s6052_s6 + $0xa8] sm:$0xff] }
 0x286   :  { %v1432_v27 = vmax.f32 %v5459_v23, %v3972_v7  ;;  %v1364_v10 = vpop.f32.mrb[47].mxu1 }
 0x287   :  { %v1431_v28 = vmax.f32 %v5461_v26, %v1364_v10  ;;  %4013 = vmatprep.mubr.msk.f32.mxu1 %vm1472_vm5, %v5597_v25 }
 0x289   :  { %v5603_v34 = vmax.f32 %v1431_v28, %v1432_v27  ;;  %v3975_v12 = vpop.f32.mrb[48].mxu1 }
 0x28a   :  { %v1434_v36 = vmax.f32 %v5463_v29, %v3975_v12  ;;  %v1374_v15 = vpop.f32.mrb[49].mxu1 }
 0x28b   :  { %v1433_v37 = vmax.f32 %v5465_v30, %v1374_v15  ;;  %4014 = vmatmul.mubr.msk.f32.gmra.mrb[64].mxu1 %vm1472_vm5, %v5603_v34  ;;  %v3261_v15 = vld [vmem:[%s6052_s6 + $0xb8] sm:$0xff] }
 0x28d   :  { %v1451_v43 = vmax.f32 %v1433_v37, %v1434_v36  ;;  %v3978_v45 = vpop.f32.mrb[50].mxu1  ;;  %v3260_v36 = vld [vmem:[%s6052_s6 + $0xb0] sm:$0xff] }
 0x28e   :  { %v1436_v23 = vmax.f32 %v5476_v38, %v3978_v45  ;;  %v1384_v46 = vpop.f32.mrb[51].mxu1 }
 0x28f   :  { %v1435_v26 = vmax.f32 %v5481_v42, %v1384_v46  ;;  %4016 = vmatprep.mubr.msk.f32.mxu1 %vm1472_vm5, %v1451_v43 }
 0x291   :  { %v1452_v49 = vmax.f32 %v1435_v26, %v1436_v23  ;;  %v3981_v32 = vpop.f32.mrb[52].mxu1  ;;  %v4502_v26 = vpack.c.bf16 %v3261_v15, %v3260_v36 }
 0x292   :  { %v1438_v52 = vmax.f32 %v5489_v50, %v3981_v32  ;;  %v1394_v29 = vpop.f32.mrb[53].mxu1  ;;  %v3219_v50 = vld [vmem:[%s6051_s4 + $0x98] sm:$0xff]  ;;  %v3262_v32 = vld [vmem:[%s6052_s6 + $0xc0] sm:$0xff] }
 0x293   :  { %v1437_v35 = vmax.f32 %v5491_v53, %v1394_v29  ;;  %4017 = vmatmul.mubr.msk.f32.gmra.mrb[66].mxu1 %vm1472_vm5, %v1452_v49  ;;  %v4672_v53 = vmov 0.0  }
 0x295   :  { %v1453_v30 = vmax.f32 %v1437_v35, %v1438_v52  ;;  %v3984_v39 = vpop.f32.mrb[54].mxu1  ;;  %v3263_v52 = vld [vmem:[%s6052_s6 + $0xc8] sm:$0xff] }
 0x296   :  { %v1440_v41 = vmax.f32 %v5499_v59, %v3984_v39  ;;  %v1404_v44 = vpop.f32.mrb[55].mxu1  ;;  %v4446_v59 = vpack.c.bf16 %v3219_v50, %v3218_v54  ;;  %v3265_v54 = vld [vmem:[%s6052_s6 + $0xd8] sm:$0xff] }
 0x297   :  { %v1439_v38 = vmax.f32 %v5501_v62, %v1404_v44  ;;  %4019 = vmatprep.mubr.msk.f32.mxu1 %vm1472_vm5, %v1453_v30  ;;  %v3220_v62 = vld [vmem:[%s6051_s4 + $0xa0] sm:$0xff]  ;;  %v4506_v44 = vpack.c.bf16 %v3263_v52, %v3262_v32 }
 0x298   :  { %v4450_v48 = vpack.c.bf16 %v3221_v40, %v3220_v62 }
 0x299   :  { %v1454_v42 = vmax.f32 %v1439_v38, %v1440_v41 }
 0x29b   :  { %4020 = vmatmul.mubr.msk.f32.gmra.mrb[68].mxu1 %vm1472_vm5, %v1454_v42 }
 0x29c   :  { %4038 = vmatprep.mubr.f32.mxu1 %v4672_v53 }
 0x29f   :  { %4039 = vmatmul.mubr.msk.f32.vlgmr.msra.gmra.mrb[56].mxu1 %vm1472_vm5, %v5515_v9  ;;  %v4454_v9 = vpack.c.bf16 %v3223_v51, %v3222_v55 }
 0x2a0   :  { %4041 = vmatprep.mubr.msk.f32.mxu1 %vm1472_vm5, %v5533_v31  ;;  %4445 = vmatpush3.bf16.msra.mxu1 %v5572_v61  ;;  %v3255_v61 = vld [vmem:[%s6052_s6 + $0x88] sm:$0xff] }
 0x2a1   :  { %4447 = vmatprep.subr.bf16.mxu1 %v4446_v59  ;;  %v4490_v20 = vpack.c.bf16 %v3255_v61, %v3254_v2  ;;  %v2344_v61 = vld [vmem:[%s6054_s7 + $0x8] sm:$0xff] }
 0x2a3   :  { %4042 = vmatmul.mubr.msk.f32.gmra.mrb[58].mxu1 %vm1472_vm5, %v5546_v33 }
 0x2a4   :  { %4044 = vmatprep.mubr.msk.f32.mxu1 %vm1472_vm5, %v5558_v47  ;;  %4449 = vmatpush3.bf16.msra.mxu1 %v4446_v59 }
 0x2a5   :  { %4451 = vmatprep.subr.bf16.mxu1 %v4450_v48 }
 0x2a7   :  { %4045 = vmatmul.mubr.msk.f32.gmra.mrb[60].mxu1 %vm1472_vm5, %v5570_v1 }
 0x2a8   :  { %4047 = vmatprep.mubr.msk.f32.mxu1 %vm1472_vm5, %v5578_v63  ;;  %4453 = vmatpush3.bf16.msra.mxu1 %v4450_v48 }
 0x2a9   :  { %4455 = vmatprep.subr.bf16.mxu1 %v4454_v9 }
 0x2ab   :  { %4048 = vmatmul.mubr.msk.f32.gmra.mrb[62].mxu1 %vm1472_vm5, %v5585_v0 }
 0x2ac   :  { %4050 = vmatprep.mubr.msk.f32.mxu1 %vm1472_vm5, %v5591_v18  ;;  %4457 = vmatpush3.bf16.msra.mxu1 %v4454_v9 }
 0x2af   :  { %4051 = vmatmul.mubr.msk.f32.gmra.mrb[64].mxu1 %vm1472_vm5, %v5597_v25 }
 0x2b0   :  { %4053 = vmatprep.mubr.msk.f32.mxu1 %vm1472_vm5, %v5603_v34 }
 0x2b3   :  { %4054 = vmatmul.mubr.msk.f32.gmra.mrb[66].mxu1 %vm1472_vm5, %v1451_v43 }
 0x2b4   :  { %4056 = vmatprep.mubr.msk.f32.mxu1 %vm1472_vm5, %v1452_v49 }
 0x2b7   :  { %4057 = vmatmul.mubr.msk.f32.gmra.mrb[68].mxu1 %vm1472_vm5, %v1453_v30 }
 0x2b8   :  { %4075 = vmatprep.mubr.msk.f32.mxu1 %vm1472_vm5, %v5533_v31  ;;  %v3252_v31 = vld [vmem:[%s6052_s6 + $0x70] sm:$0xff] }
 0x2bb   :  { %4076 = vmatmul.mubr.msk.f32.vlgmr.msra.gmra.mrb[56].mxu1 %vm1472_vm5, %v5546_v33  ;;  %v3253_v33 = vld [vmem:[%s6052_s6 + $0x78] sm:$0xff] }
 0x2bc   :  { %4078 = vmatprep.mubr.msk.f32.mxu1 %vm1472_vm5, %v5558_v47  ;;  %v4486_v47 = vpack.c.bf16 %v3253_v33, %v3252_v31  ;;  %v4673_v33 = vmov 0.0|0.0  }
 0x2bd   :  { %4514 = vmatprep.subr.bf16.mxu1 %v4673_v33 }
 0x2be   :  { %4487 = vmatprep.subr.bf16.mxu0 %v4486_v47 }
 0x2bf   :  { %4079 = vmatmul.mubr.msk.f32.gmra.mrb[58].mxu1 %vm1472_vm5, %v5570_v1 }
 0x2c0   :  { %4081 = vmatprep.mubr.msk.f32.mxu1 %vm1472_vm5, %v5578_v63 }
 0x2c3   :  { %4082 = vmatmul.mubr.msk.f32.gmra.mrb[60].mxu1 %vm1472_vm5, %v5585_v0  ;;  %v3257_v0 = vld [vmem:[%s6052_s6 + $0x98] sm:$0xff] }
 0x2c4   :  { %4084 = vmatprep.mubr.msk.f32.mxu1 %vm1472_vm5, %v5591_v18  ;;  %v4494_v4 = vpack.c.bf16 %v3257_v0, %v3256_v24  ;;  %v2348_v0 = vld [vmem:[%s6054_s7 + $0x28] sm:$0xff] }
 0x2c7   :  { %4085 = vmatmul.mubr.msk.f32.gmra.mrb[62].mxu1 %vm1472_vm5, %v5597_v25 }
 0x2c8   :  { %4087 = vmatprep.mubr.msk.f32.mxu1 %vm1472_vm5, %v5603_v34  ;;  %v4498_v34 = vpack.c.bf16 %v3259_v22, %v3258_v6 }
 0x2cb   :  { %4088 = vmatmul.mubr.msk.f32.gmra.mrb[64].mxu1 %vm1472_vm5, %v1451_v43 }
 0x2cc   :  { %4090 = vmatprep.mubr.msk.f32.mxu1 %vm1472_vm5, %v1452_v49 }
 0x2cf   :  { %4091 = vmatmul.mubr.msk.f32.gmra.mrb[66].mxu1 %vm1472_vm5, %v1453_v30 }
 0x2d0   :  { %4093 = vmatprep.mubr.msk.f32.mxu1 %vm1472_vm5, %v1454_v42  ;;  %v3264_v42 = vld [vmem:[%s6052_s6 + $0xd0] sm:$0xff] }
 0x2d1   :  { %v4510_v55 = vpack.c.bf16 %v3265_v54, %v3264_v42  ;;  %v3291_v54 = vld [vmem:[%s6054_s7 + $0x80] sm:$0xff] }
 0x2d3   :  { %4094 = vmatmul.mubr.f32.gmra.mrb[68].mxu1 %v4672_v53 }
 0x2d4   :  { %4208 = vmatprep.mubr.msk.f32.mxu1 %vm4674_vm6, %v4672_v53 }
 0x38e   :  { %v4077_v57 = vpop.f32.mrb[56].mxu1 }
 0x38f   :  { %v5697_v58 = vadd.f32 %v4077_v57, %v5694_v56  ;;  %v1863_v60 = vpop.f32.mrb[57].mxu1 }
 0x390   :  { %v5700_v1 = vadd.f32 %v5694_v56, %v1863_v60  ;;  %v3283_v60 = vld [vmem:[%s6054_s7 + $0x50] sm:$0xff] }
 0x391   :  { %v1968_v14 = vmax.f32 %v5697_v58, 0.0  ;;  %v3282_v58 = vld [vmem:[%s6054_s7 + $0x48] sm:$0xff] }
 0x392   :  { %v1967_v5 = vmax.f32 %v5700_v1, 0.0  ;;  %v4080_v8 = vpop.f32.mrb[58].mxu1  ;;  %v2343_v1 = vld [vmem:[%s6054_s7] sm:$0xff]  ;;  %v4518_v2 = vpack.c.bf16 %v3283_v60, %v3282_v58  ;;  %v3293_v58 = vld [vmem:[%s6054_s7 + $0x90] sm:$0xff]  ;;  %v3294_v60 = vld [vmem:[%s6054_s7 + $0x98] sm:$0xff] }
 0x393   :  { %v5711_v63 = vadd.f32 %v4080_v8, %v5694_v56  ;;  %v1873_v17 = vpop.f32.mrb[59].mxu1  ;;  %v2345_v8 = vld [vmem:[%s6054_s7 + $0x10] sm:$0xff] }
 0x394   :  { %v5714_v21 = vadd.f32 %v5694_v56, %v1873_v17  ;;  %4124 = vmatprep.mubr.msk.f32.mxu0 %vm903_vm4, %v1967_v5  ;;  %v3284_v17 = vld [vmem:[%s6054_s7 + $0x58] sm:$0xff] }
 0x395   :  { %4125 = vmatmul.mubr.msk.f32.vlgmr.msra.gmra.mrb[28].mxu0 %vm903_vm4, %v1968_v14  ;;  %v1970_v13 = vmax.f32 %v5711_v63, 0.0 }
 0x396   :  { %v1969_v3 = vmax.f32 %v5714_v21, 0.0  ;;  %v4083_v11 = vpop.f32.mrb[60].mxu1  ;;  %4489 = vmatpush3.bf16.msra.mxu0 %v4486_v47  ;;  %v3280_v47 = vld [vmem:[%s6054_s7 + $0x38] sm:$0xff]  ;;  %v2347_v21 = vld [vmem:[%s6054_s7 + $0x20] sm:$0xff] }
 0x397   :  { %v5731_v16 = vadd.f32 %v4083_v11, %v5694_v56  ;;  %v1883_v18 = vpop.f32.mrb[61].mxu1  ;;  %4491 = vmatprep.subr.bf16.mxu0 %v4490_v20  ;;  %v2349_v11 = vld [vmem:[%s6054_s7 + $0x30] sm:$0xff] }
 0x398   :  { %v5734_v19 = vadd.f32 %v5694_v56, %v1883_v18  ;;  %4127 = vmatprep.mubr.msk.f32.mxu0 %vm903_vm4, %v1969_v3 }
 0x399   :  { %4128 = vmatmul.mubr.msk.f32.gmra.mrb[30].mxu0 %vm903_vm4, %v1970_v13  ;;  %v1972_v27 = vmax.f32 %v5731_v16, 0.0 }
 0x39a   :  { %v1971_v25 = vmax.f32 %v5734_v19, 0.0  ;;  %v4086_v7 = vpop.f32.mrb[62].mxu1  ;;  %4493 = vmatpush3.bf16.msra.mxu0 %v4490_v20  ;;  %v3285_v20 = vld [vmem:[%s6054_s7 + $0x60] sm:$0xff] }
 0x39b   :  { %v1960_v10 = vadd.f32 %v4086_v7, %v5694_v56  ;;  %v1893_v28 = vpop.f32.mrb[63].mxu1  ;;  %4495 = vmatprep.subr.bf16.mxu0 %v4494_v4  ;;  %v4521_v24 = vpack.c.bf16 %v3285_v20, %v3284_v17  ;;  %v3303_v20 = vld [vmem:[%s6054_s7 + $0xd8] sm:$0xff] }
 0x39c   :  { %v1959_v12 = vadd.f32 %v5694_v56, %v1893_v28  ;;  %4130 = vmatprep.mubr.msk.f32.mxu0 %vm903_vm4, %v1971_v25 }
 0x39d   :  { %4131 = vmatmul.mubr.msk.f32.gmra.mrb[32].mxu0 %vm903_vm4, %v1972_v27  ;;  %v1974_v45 = vmax.f32 %v1960_v10, 0.0 }
 0x39e   :  { %v1973_v37 = vmax.f32 %v1959_v12, 0.0  ;;  %v4089_v43 = vpop.f32.mrb[64].mxu1  ;;  %4497 = vmatpush3.bf16.msra.mxu0 %v4494_v4 }
 0x39f   :  { %v1962_v23 = vadd.f32 %v4089_v43, %v5694_v56  ;;  %v1903_v46 = vpop.f32.mrb[65].mxu1  ;;  %4499 = vmatprep.subr.bf16.mxu0 %v4498_v34  ;;  %v3298_v43 = vld [vmem:[%s6054_s7 + $0xb0] sm:$0xff] }
 0x3a0   :  { %v1961_v49 = vadd.f32 %v5694_v56, %v1903_v46  ;;  %4133 = vmatprep.mubr.msk.f32.mxu0 %vm903_vm4, %v1973_v37 }
 0x3a1   :  { %4134 = vmatmul.mubr.msk.f32.gmra.mrb[34].mxu0 %vm903_vm4, %v1974_v45  ;;  %v1976_v30 = vmax.f32 %v1962_v23, 0.0 }
 0x3a2   :  { %v1975_v29 = vmax.f32 %v1961_v49, 0.0  ;;  %v4092_v35 = vpop.f32.mrb[66].mxu1  ;;  %4501 = vmatpush3.bf16.msra.mxu0 %v4498_v34  ;;  %v3289_v49 = vld [vmem:[%s6054_s7 + $0x70] sm:$0xff] }
 0x3a3   :  { %v1964_v39 = vadd.f32 %v4092_v35, %v5694_v56  ;;  %v1913_v41 = vpop.f32.mrb[67].mxu1  ;;  %4503 = vmatprep.subr.bf16.mxu0 %v4502_v26  ;;  %v3299_v35 = vld [vmem:[%s6054_s7 + $0xb8] sm:$0xff] }
 0x3a4   :  { %v1963_v38 = vadd.f32 %v5694_v56, %v1913_v41  ;;  %4136 = vmatprep.mubr.msk.f32.mxu0 %vm903_vm4, %v1975_v29 }
 0x3a5   :  { %4137 = vmatmul.mubr.msk.f32.gmra.mrb[36].mxu0 %vm903_vm4, %v1976_v30  ;;  %v1978_v62 = vmax.f32 %v1964_v39, 0.0 }
 0x3a6   :  { %v1977_v50 = vmax.f32 %v1963_v38, 0.0  ;;  %v4095_v59 = vpop.f32.mrb[68].mxu1  ;;  %4505 = vmatpush3.bf16.msra.mxu0 %v4502_v26 }
 0x3a7   :  { %v1966_v40 = vadd.f32 %v4095_v59, %v5694_v56  ;;  %v1923_v48 = vpop.f32.mrb[69].mxu1  ;;  %4507 = vmatprep.subr.bf16.mxu0 %v4506_v44 }
 0x3a8   :  { %v1965_v51 = vadd.f32 %v5694_v56, %v1923_v48  ;;  %4139 = vmatprep.mubr.msk.f32.mxu0 %vm903_vm4, %v1977_v50  ;;  %v3281_v56 = vld [vmem:[%s6054_s7 + $0x40] sm:$0xff]  ;;  %v3302_v48 = vld [vmem:[%s6054_s7 + $0xd0] sm:$0xff] }
 0x3a9   :  { %4140 = vmatmul.mubr.msk.f32.gmra.mrb[38].mxu0 %vm903_vm4, %v1978_v62  ;;  %v1980_v31 = vmax.f32 %v1966_v40, 0.0  ;;  %v4515_v57 = vpack.c.bf16 %v3281_v56, %v3280_v47  ;;  %v3301_v40 = vld [vmem:[%s6054_s7 + $0xc8] sm:$0xff] }
 0x3aa   :  { %v1979_v9 = vmax.f32 %v1965_v51, 0.0  ;;  %4509 = vmatpush3.bf16.msra.mxu0 %v4506_v44  ;;  %v4548_v47 = vpack.c.bf16 %v3302_v48, %v3301_v40  ;;  %v3327_v40 = vld [vmem:[%s6054_s7 + $0x180] sm:$0xff] }
 0x3ab   :  { %4511 = vmatprep.subr.bf16.mxu0 %v4510_v55  ;;  %4516 = vmatpush3.bf16.msra.mxu1 %v4515_v57  ;;  %v2924_v48 = vld [vmem:[%s6055_s9] sm:$0xff] }
 0x3ac   :  { %4142 = vmatprep.mubr.msk.f32.mxu0 %vm903_vm4, %v1979_v9  ;;  %4517 = vmatprep.subr.bf16.mxu1 %v4673_v33 }
 0x3ad   :  { %4143 = vmatmul.mubr.msk.f32.gmra.mrb[40].mxu0 %vm903_vm4, %v1980_v31 }
 0x3ae   :  { %4513 = vmatpush3.bf16.msra.mxu0 %v4510_v55  ;;  %4173 = vmatprep.mubr.msk.f32.mxu0 %vm903_vm4, %v1967_v5  ;;  %v4524_v5 = vpack.c.bf16 %v2344_v61, %v2343_v1 }
 0x3af   :  { %4523 = vmatprep.subr.bf16.mxu0 %v4673_v33  ;;  %4519 = vmatpush3.bf16.msra.mxu1 %v4518_v2 }
 0x3b0   :  { %4520 = vmatprep.subr.bf16.mxu1 %v4673_v33 }
 0x3b1   :  { %4174 = vmatmul.mubr.msk.f32.vlgmr.msra.gmra.mrb[42].mxu0 %vm903_vm4, %v1968_v14  ;;  %v2346_v14 = vld [vmem:[%s6054_s7 + $0x18] sm:$0xff] }
 0x3b2   :  { %4176 = vmatprep.mubr.msk.f32.mxu0 %vm903_vm4, %v1969_v3  ;;  %4525 = vmatpush3.bf16.msra.mxu0 %v4524_v5  ;;  %v4527_v63 = vpack.c.bf16 %v2346_v14, %v2345_v8  ;;  %v4530_v3 = vpack.c.bf16 %v2348_v0, %v2347_v21  ;;  %v3313_v5 = vld [vmem:[%s6054_s7 + $0x118] sm:$0xff]  ;;  %v3314_v8 = vld [vmem:[%s6054_s7 + $0x120] sm:$0xff]  ;;  %v4539_v14 = vpack.c.bf16 %v3294_v60, %v3293_v58 }
 0x3b3   :  { %4526 = vmatprep.subr.bf16.mxu0 %v4673_v33  ;;  %4522 = vmatpush3.bf16.msra.mxu1 %v4521_v24  ;;  %v4560_v0 = vpack.c.bf16 %v3314_v8, %v3313_v5 }
 0x3b4   :  { %4206 = vmatprep.subr.mxu1 %v4672_v53 }
 0x3b5   :  { %4177 = vmatmul.mubr.msk.f32.gmra.mrb[44].mxu0 %vm903_vm4, %v1970_v13  ;;  %v3286_v13 = vld [vmem:[%s6054_s7 + $0x68] sm:$0xff] }
 0x3b6   :  { %4179 = vmatprep.mubr.msk.f32.mxu0 %vm903_vm4, %v1971_v25  ;;  %4528 = vmatpush3.bf16.msra.mxu0 %v4527_v63 }
 0x3b7   :  { %4529 = vmatprep.subr.bf16.mxu0 %v4673_v33  ;;  %4207 = vmatpush3.msra.mxu1 %v3286_v13  ;;  %v3306_v13 = vld [vmem:[%s6054_s7 + $0xe8] sm:$0xff] }
 0x3b8   :  { %4532 = vmatprep.subr.bf16.mxu1 %v4673_v33 }
 0x3b9   :  { %4180 = vmatmul.mubr.msk.f32.gmra.mrb[46].mxu0 %vm903_vm4, %v1972_v27 }
 0x3ba   :  { %4182 = vmatprep.mubr.msk.f32.mxu0 %vm903_vm4, %v1973_v37  ;;  %4531 = vmatpush3.bf16.msra.mxu0 %v4530_v3  ;;  %v3297_v37 = vld [vmem:[%s6054_s7 + $0xa8] sm:$0xff]  ;;  %v3305_v3 = vld [vmem:[%s6054_s7 + $0xe0] sm:$0xff] }
 0x3bb   :  { %4223 = vmatprep.subr.mxu0 %v4672_v53  ;;  %v4542_v26 = vpack.c.bf16 %v3298_v43, %v3297_v37  ;;  %v3308_v37 = vld [vmem:[%s6054_s7 + $0xf8] sm:$0xff]  ;;  %v3318_v43 = vld [vmem:[%s6054_s7 + $0x140] sm:$0xff] }
 0x3bd   :  { %4183 = vmatmul.mubr.msk.f32.gmra.mrb[48].mxu0 %vm903_vm4, %v1974_v45 }
 0x3be   :  { %4185 = vmatprep.mubr.msk.f32.mxu0 %vm903_vm4, %v1975_v29  ;;  %4224 = vmatpush3.msra.mxu0 %v2349_v11  ;;  %v3290_v29 = vld [vmem:[%s6054_s7 + $0x78] sm:$0xff] }
 0x3bf   :  { %4541 = vmatprep.subr.bf16.mxu0 %v4673_v33  ;;  %v4533_v38 = vpack.c.bf16 %v3290_v29, %v3289_v49  ;;  %v3310_v29 = vld [vmem:[%s6054_s7 + $0x108] sm:$0xff] }
 0x3c1   :  { %4186 = vmatmul.mubr.msk.f32.gmra.mrb[50].mxu0 %vm903_vm4, %v1976_v30  ;;  %v3300_v30 = vld [vmem:[%s6054_s7 + $0xc0] sm:$0xff] }
 0x3c2   :  { %4188 = vmatprep.mubr.msk.f32.mxu0 %vm903_vm4, %v1977_v50  ;;  %v4545_v42 = vpack.c.bf16 %v3300_v30, %v3299_v35  ;;  %v3321_v30 = vld [vmem:[%s6054_s7 + $0x150] sm:$0xff] }
 0x3c5   :  { %4189 = vmatmul.mubr.msk.f32.gmra.mrb[52].mxu0 %vm903_vm4, %v1978_v62  ;;  %v3292_v62 = vld [vmem:[%s6054_s7 + $0x88] sm:$0xff] }
 0x3c6   :  { %4191 = vmatprep.mubr.msk.f32.mxu0 %vm903_vm4, %v1979_v9 }
 0x3c9   :  { %4192 = vmatmul.mubr.msk.f32.gmra.mrb[54].mxu0 %vm903_vm4, %v1980_v31  ;;  %v4536_v31 = vpack.c.bf16 %v3292_v62, %v3291_v54 }
 0x3ca   :  { %4225 = vmatprep.mubr.msk.f32.mxu0 %vm4674_vm6, %v4672_v53 }
 0x468   :  { %v4126_v16 = vpop.f32.mrb[28].mxu0 }
 0x469   :  { %v2103_v18 = vpop.f32.mrb[29].mxu0 }
 0x46c   :  { %v4129_v4 = vpop.f32.mrb[30].mxu0 }
 0x46d   :  { %v2113_v19 = vpop.f32.mrb[31].mxu0 }
 0x470   :  { %v4132_v6 = vpop.f32.mrb[32].mxu0 }
 0x471   :  { %v2123_v22 = vpop.f32.mrb[33].mxu0 }
 0x474   :  { %v4135_v25 = vpop.f32.mrb[34].mxu0 }
 0x475   :  { %v2133_v7 = vpop.f32.mrb[35].mxu0 }
 0x478   :  { %v5864_v27 = vpop.f32.mrb[36].mxu0 }
 0x479   :  { %v5866_v10 = vpop.f32.mrb[37].mxu0 }
 0x47c   :  { %v5868_v28 = vpop.f32.mrb[38].mxu0 }
 0x47d   :  { %v5870_v34 = vpop.f32.mrb[39].mxu0 }
 0x480   :  { %v5872_v12 = vpop.f32.mrb[40].mxu0 }
 0x481   :  { %v5874_v36 = vpop.f32.mrb[41].mxu0 }
 0x484   :  { %v4175_v15 = vpop.f32.mrb[42].mxu0 }
 0x485   :  { %v2323_v45 = vmax.f32 %v4126_v16, %v4175_v15  ;;  %v2253_v23 = vpop.f32.mrb[43].mxu0  ;;  %v3315_v16 = vld [vmem:[%s6054_s7 + $0x128] sm:$0xff] }
 0x486   :  { %v2322_v46 = vmax.f32 %v2103_v18, %v2253_v23  ;;  %v3316_v18 = vld [vmem:[%s6054_s7 + $0x130] sm:$0xff] }
 0x488   :  { %v2336_v32 = vmax.f32 %v2322_v46, %v2323_v45  ;;  %v4178_v52 = vpop.f32.mrb[44].mxu0 }
 0x489   :  { %v2325_v39 = vmax.f32 %v4129_v4, %v4178_v52  ;;  %v2263_v41 = vpop.f32.mrb[45].mxu0  ;;  %v3309_v52 = vld [vmem:[%s6054_s7 + $0x100] sm:$0xff] }
 0x48a   :  { %v2324_v44 = vmax.f32 %v2113_v19, %v2263_v41  ;;  %4226 = vmatmul.mubr.msk.f32.vlgmr.msra.gmra.mrb[56].mxu0 %vm2358_vm7, %v2336_v32  ;;  %v4557_v35 = vpack.c.bf16 %v3310_v29, %v3309_v52  ;;  %v3311_v41 = vld [vmem:[%s6054_s7 + $0x110] sm:$0xff] }
 0x48b   :  { %4543 = vmatpush3.bf16.msra.mxu0 %v4542_v26  ;;  %4259 = vmatprep.mubr.msk.f32.mxu0 %vm4674_vm6, %v4672_v53 }
 0x48c   :  { %v2337_v50 = vmax.f32 %v2324_v44, %v2325_v39  ;;  %v4181_v59 = vpop.f32.mrb[46].mxu0  ;;  %4544 = vmatprep.subr.bf16.mxu0 %v4673_v33  ;;  %v3322_v39 = vld [vmem:[%s6054_s7 + $0x158] sm:$0xff] }
 0x48d   :  { %v2327_v55 = vmax.f32 %v4132_v6, %v4181_v59  ;;  %v2273_v51 = vpop.f32.mrb[47].mxu0  ;;  %v3295_v6 = vld [vmem:[%s6054_s7 + $0xa0] sm:$0xff]  ;;  %v4569_v44 = vpack.c.bf16 %v3322_v39, %v3321_v30  ;;  %v3326_v59 = vld [vmem:[%s6054_s7 + $0x178] sm:$0xff] }
 0x48e   :  { %v2326_v9 = vmax.f32 %v2123_v22, %v2273_v51  ;;  %4209 = vmatmul.mubr.msk.f32.vlgmr.msra.gmra.mrb[70].mxu1 %vm2358_vm7, %v2337_v50  ;;  %v3325_v50 = vld [vmem:[%s6054_s7 + $0x170] sm:$0xff] }
 0x48f   :  { %4534 = vmatpush3.bf16.msra.mxu1 %v4533_v38  ;;  %4546 = vmatpush3.bf16.msra.mxu0 %v4545_v42  ;;  %v3323_v38 = vld [vmem:[%s6054_s7 + $0x160] sm:$0xff]  ;;  %v3324_v42 = vld [vmem:[%s6054_s7 + $0x168] sm:$0xff]  ;;  %v4575_v62 = vpack.c.bf16 %v3326_v59, %v3325_v50 }
 0x490   :  { %v2338_v56 = vmax.f32 %v2326_v9, %v2327_v55  ;;  %v4184_v57 = vpop.f32.mrb[48].mxu0  ;;  %4535 = vmatprep.subr.bf16.mxu1 %v4673_v33  ;;  %4547 = vmatprep.subr.bf16.mxu0 %v4673_v33  ;;  %v4572_v54 = vpack.c.bf16 %v3324_v42, %v3323_v38  ;;  %v2925_v55 = vld [vmem:[%s6055_s9 + $0x8] sm:$0xff]  ;;  %v2927_v9 = vld [vmem:[%s6055_s9 + $0x18] sm:$0xff] }
 0x491   :  { %v2329_v1 = vmax.f32 %v4135_v25, %v4184_v57  ;;  %v2283_v2 = vpop.f32.mrb[49].mxu0  ;;  %4242 = vmatprep.mubr.msk.f32.mxu1 %vm4674_vm6, %v4672_v53  ;;  %v4578_v51 = vpack.c.bf16 %v2925_v55, %v2924_v48 }
 0x492   :  { %v2328_v61 = vmax.f32 %v2133_v7, %v2283_v2  ;;  %v4551_v7 = vpack.c.bf16 %v3306_v13, %v3305_v3  ;;  %v3329_v3 = vld [vmem:[%s6056_s8] ss:$0 sm:$0xff] }
 0x493   :  { %4537 = vmatpush3.bf16.msra.mxu1 %v4536_v31  ;;  %4549 = vmatpush3.bf16.msra.mxu0 %v4548_v47 }
 0x494   :  { %v2339_v63 = vmax.f32 %v2328_v61, %v2329_v1  ;;  %v4187_v17 = vpop.f32.mrb[50].mxu0  ;;  %4538 = vmatprep.subr.bf16.mxu1 %v4673_v33  ;;  %4257 = vmatprep.subr.mxu0 %v4672_v53 }
 0x495   :  { %v2331_v21 = vmax.f32 %v5864_v27, %v4187_v17  ;;  %v2293_v24 = vpop.f32.mrb[51].mxu0  ;;  %v4563_v27 = vpack.c.bf16 %v3316_v18, %v3315_v16 }
 0x496   :  { %v2330_v11 = vmax.f32 %v5866_v10, %v2293_v24  ;;  %v3307_v10 = vld [vmem:[%s6054_s7 + $0xf0] sm:$0xff] }
 0x497   :  { %4540 = vmatpush3.bf16.msra.mxu1 %v4539_v14  ;;  %4258 = vmatpush3.msra.mxu0 %v3303_v20  ;;  %v4554_v26 = vpack.c.bf16 %v3308_v37, %v3307_v10 }
 0x498   :  { %v2340_v4 = vmax.f32 %v2330_v11, %v2331_v21  ;;  %4260 = vmatmul.mubr.msk.f32.vlgmr.msra.gmra.mrb[58].mxu0 %vm2358_vm7, %v2339_v63  ;;  %4559 = vmatprep.subr.bf16.mxu0 %v4673_v33  ;;  %v4190_v19 = vpop.f32.mrb[52].mxu0 }
 0x499   :  { %v2333_v22 = vmax.f32 %v5868_v28, %v4190_v19  ;;  %4561 = vmatpush3.bf16.msra.mxu0 %v4560_v0  ;;  %v2303_v25 = vpop.f32.mrb[53].mxu0  ;;  %4240 = vmatprep.subr.mxu1 %v4672_v53  ;;  %v3317_v28 = vld [vmem:[%s6054_s7 + $0x138] sm:$0xff] }
 0x49a   :  { %v2332_v15 = vmax.f32 %v5870_v34, %v2303_v25  ;;  %4562 = vmatprep.subr.bf16.mxu0 %v4673_v33  ;;  %4293 = vmatprep.mubr.msk.f32.mxu0 %vm4674_vm6, %v4672_v53  ;;  %v4566_v49 = vpack.c.bf16 %v3318_v43, %v3317_v28 }
 0x49b   :  { %4241 = vmatpush3.msra.mxu1 %v3295_v6 }
 0x49c   :  { %v2341_v45 = vmax.f32 %v2332_v15, %v2333_v22  ;;  %4243 = vmatmul.mubr.msk.f32.vlgmr.msra.gmra.mrb[72].mxu1 %vm2358_vm7, %v2338_v56  ;;  %4550 = vmatprep.subr.bf16.mxu1 %v4673_v33  ;;  %v4193_v34 = vpop.f32.mrb[54].mxu0 }
 0x49d   :  { %v2335_v23 = vmax.f32 %v5872_v12, %v4193_v34  ;;  %4552 = vmatpush3.bf16.msra.mxu1 %v4551_v7  ;;  %4564 = vmatpush3.bf16.msra.mxu0 %v4563_v27  ;;  %v2313_v46 = vpop.f32.mrb[55].mxu0 }
 0x49e   :  { %v2334_v32 = vmax.f32 %v5874_v36, %v2313_v46  ;;  %4553 = vmatprep.subr.bf16.mxu1 %v4673_v33  ;;  %4565 = vmatprep.subr.bf16.mxu0 %v4673_v33  ;;  %v3319_v36 = vld [vmem:[%s6054_s7 + $0x148] sm:$0xff] }
 0x49f   :  { %4276 = vmatprep.mubr.msk.f32.mxu1 %vm4674_vm6, %v4672_v53 }
 0x4a0   :  { %v2342_v12 = vmax.f32 %v2334_v32, %v2335_v23 }
 0x4a1   :  { %4555 = vmatpush3.bf16.msra.mxu1 %v4554_v26  ;;  %4567 = vmatpush3.bf16.msra.mxu0 %v4566_v49 }
 0x4a2   :  { %4556 = vmatprep.subr.bf16.mxu1 %v4673_v33  ;;  %4291 = vmatprep.subr.mxu0 %v4672_v53 }
 0x4a5   :  { %4558 = vmatpush3.bf16.msra.mxu1 %v4557_v35  ;;  %4292 = vmatpush3.msra.mxu0 %v3319_v36 }
 0x4a6   :  { %4294 = vmatmul.mubr.msk.f32.vlgmr.msra.gmra.mrb[60].mxu0 %vm2358_vm7, %v2341_v45  ;;  %4274 = vmatprep.subr.mxu1 %v4672_v53 }
 0x4a7   :  { %4577 = vmatprep.subr.bf16.mxu0 %v4673_v33  ;;  %4321 = vmatprep.mubr.msk.f32.mxu0 %vm4674_vm6, %v4672_v53 }
 0x4a8   :  { %4579 = vmatpush3.bf16.msra.mxu0 %v4578_v51 }
 0x4a9   :  { %4275 = vmatpush3.msra.mxu1 %v3311_v41  ;;  %4580 = vmatprep.subr.bf16.mxu0 %v4673_v33 }
 0x4aa   :  { %4277 = vmatmul.mubr.msk.f32.vlgmr.msra.gmra.mrb[74].mxu1 %vm2358_vm7, %v2340_v4  ;;  %4568 = vmatprep.subr.bf16.mxu1 %v4673_v33  ;;  %v3330_v4 = vld [vmem:[%s6057_s10] ss:$0 sm:$0xff] }
 0x4ab   :  { %4570 = vmatpush3.bf16.msra.mxu1 %v4569_v44  ;;  %4310 = vmatprep.mubr.msk.f32.mxu1 %vm4674_vm6, %v4672_v53 }
 0x4ac   :  { %4571 = vmatprep.subr.bf16.mxu1 %v4673_v33 }
 0x4af   :  { %4573 = vmatpush3.bf16.msra.mxu1 %v4572_v54 }
 0x4b0   :  { %4574 = vmatprep.subr.bf16.mxu1 %v4673_v33 }
 0x4b3   :  { %4576 = vmatpush3.bf16.msra.mxu1 %v4575_v62 }
 0x4b4   :  { %4308 = vmatprep.subr.mxu1 %v4672_v53  ;;  %v2926_v53 = vld [vmem:[%s6055_s9 + $0x10] sm:$0xff] }
 0x4b5   :  { %v4581_v31 = vpack.c.bf16 %v2927_v9, %v2926_v53 }
 0x4b7   :  { %4309 = vmatpush3.msra.mxu1 %v3327_v40  ;;  %4582 = vmatpush3.bf16.msra.mxu0 %v4581_v31 }
 0x4b8   :  { %4311 = vmatmul.mubr.msk.f32.vlgmr.msra.gmra.mrb[76].mxu1 %vm2358_vm7, %v2342_v12 }
 0x55d   :  { %v2501_v47 = vpop.f32.mrb[56].mxu0 }
 0x55e   :  { %v4227_v56 = vpop.f32.mrb[57].mxu0 }
 0x561   :  { %v2428_v57 = vpop.f32.mrb[70].mxu1 }
 0x562   :  { %v2502_v58 = vadd.f32 %v2501_v47, %v2428_v57  ;;  %v4210_v60 = vpop.f32.mrb[71].mxu1 }
 0x56b   :  { %v2664_v1 = vpop.f32.mrb[58].mxu0 }
 0x56c   :  { %v4261_v2 = vpop.f32.mrb[59].mxu0 }
 0x56f   :  { %v2582_v61 = vpop.f32.mrb[72].mxu1 }
 0x570   :  { %v2586_v5 = vadd.f32 %v2582_v61, %v2502_v58  ;;  %v4244_v33 = vpop.f32.mrb[73].mxu1 }
 0x572   :  { %v2668_v8 = vadd.f32 %v2664_v1, %v2586_v5 }
 0x579   :  { %v2828_v14 = vpop.f32.mrb[60].mxu0 }
 0x57a   :  { %v4295_v63 = vpop.f32.mrb[61].mxu0 }
 0x57d   :  { %v2746_v17 = vpop.f32.mrb[74].mxu1 }
 0x57e   :  { %v2750_v20 = vadd.f32 %v2746_v17, %v2668_v8  ;;  %v4278_v21 = vpop.f32.mrb[75].mxu1 }
 0x580   :  { %v2832_v24 = vadd.f32 %v2828_v14, %v2750_v20 }
 0x58b   :  { %v2910_v0 = vpop.f32.mrb[76].mxu1 }
 0x58c   :  { %v2914_v11 = vadd.f32 %v2910_v0, %v2832_v24  ;;  %v4312_v13 = vpop.f32.mrb[77].mxu1 }
 0x58e   :  { %v2922_v16 = vadd.f32 %v3329_v3, %v2914_v11 }
 0x590   :  { %v2923_v18 = vmax.f32 %v2922_v16, 0.0 }
 0x592   :  { %4322 = vmatmul.mubr.msk.f32.vlgmr.msra.gmra.mrb[62].mxu0 %vm2935_vm8, %v2923_v18 }
 0x665   :  { %v3005_v19 = vpop.f32.mrb[62].mxu0 }
 0x666   :  { %v3006_v6 = vadd.f32 %v3330_v4, %v3005_v19  ;;  %v4323_v22 = vpop.f32.mrb[63].mxu0 }
 0x668   :  { %3010 = vst.msk [vmem:[%s6058_s11] sm:$0xff] %vm3009_vm9, %v3006_v6 }

</bundles_post_ra>
